<compile_context>
chip_gen: v7x
topology: tpu7x:2x2x1
jax: 0.10.0
libtpu: 0.0.40
codegen_flags: <defaults>
</compile_context>

<pallas_src>
import functools

import jax
import jax.numpy as jnp
from jax.experimental import pallas as pl
from jax.experimental.pallas import tpu as pltpu

LEAKAGE = 0.001
BN_EPS = 1e-5


# ----------------------------- helpers ---------------------------------------


def _round_up(x, m):
    return (x + m - 1) // m * m


def _vmem_capacity_bytes():
    try:
        return int(pltpu.get_tpu_info().vmem_capacity_bytes)
    except Exception:
        return 64 * 1024 * 1024  # conservative (v7x-sized) default


def _pick_pixel_tile(lext, cin_p, cp, kk, halo_pad, in_item, interm_item, budget):
    """Largest 128-multiple pixel tile whose double-buffered pass-1 footprint fits."""
    cap = max(128, min(_round_up(lext, 128), 16384))
    best = 128
    t = 128
    while t <= cap:
        need = 2 * cin_p * t * in_item              # input stream (double buffered)
        need += 2 * cin_p * halo_pad * in_item      # halo stream
        need += 2 * t * 4                           # mask stream
        need += 2 * kk * cp * cin_p * in_item       # weights (resident)
        need += 2 * cp * 4                          # bias
        need += 2 * cp * t * interm_item            # conv activation stream
        need += 4 * cp * 4                          # stat accumulators
        need += cin_p * (t + halo_pad) * in_item    # slab scratch
        need += 2 * cp * t * 4                      # f32 accumulator temporaries
        if int(need * 1.25) <= budget:              # headroom for Mosaic temporaries
            best = t
        t += 128
    return best


# ----------------------------- kernels ----------------------------------------


def _conv_stats_kernel(x_ref, hal_ref, mask_ref, w_ref, b_ref,
                       conv_ref, sum_ref, sq_ref, slab_ref, *,
                       kernel, wp, precision):
    """Pass 1: conv tile on the MXU + masked per-channel sum / sum-of-squares.

    x_ref:    (1, Cin_p, THW)       flattened zero-padded input, this pixel tile
    hal_ref:  (1, 1, Cin_p, HALO)   the HALO lanes that follow this tile
    mask_ref: (1, THW)              1.0 for lanes that are real (strided) output pixels
    w_ref:    (K*K, Cp, Cin_p)      conv weights, one (Cout, Cin) slice per tap
    b_ref:    (Cp, 1)               conv bias column (f32)
    conv_ref: (1, Cout, THW)        conv activation (+bias), intermediate dtype
    sum_ref:  (1, 1, Cp, 1)         resident per-channel sum   of (conv - bias)
    sq_ref:   (1, 1, Cp, 1)         resident per-channel sumsq of (conv - bias)
    slab_ref: (Cin_p, THW + HALO)   VMEM scratch: tile + halo, contiguous
    """
    @pl.when(pl.program_id(2) == 0)
    def _init():
        sum_ref[...] = jnp.zeros_like(sum_ref)
        sq_ref[...] = jnp.zeros_like(sq_ref)

    thw = x_ref.shape[-1]
    cp = w_ref.shape[1]

    # Contiguous slab = [this tile | halo] so every conv tap is a static lane offset.
    slab_ref[:, :thw] = x_ref[0]
    slab_ref[:, thw:] = hal_ref[0, 0]

    acc = jnp.zeros((cp, thw), jnp.float32)
    for kh in range(kernel):
        for kw in range(kernel):
            off = kh * wp + kw
            acc = acc + jnp.dot(w_ref[kh * kernel + kw],
                                slab_ref[:, off:off + thw],
                                preferred_element_type=jnp.float32,
                                precision=precision)

    n_ch = conv_ref.shape[1]
    conv_ref[0] = (acc[:n_ch] + b_ref[:n_ch]).astype(conv_ref.dtype)

    # Bias-shifted moments (f32); invalid / padded lanes are masked out.
    m = mask_ref[...]                                   # (1, THW)
    am = acc * m
    sum_ref[0, 0] += jnp.sum(am, axis=1, keepdims=True)
    sq_ref[0, 0] += jnp.sum(am * acc, axis=1, keepdims=True)


def _bn_act_kernel(conv_ref, scale_ref, shift_ref, out_ref):
    """Pass 2: y = conv * scale + shift, then LeakyReLU.  Fully parallel."""
    y = conv_ref[0].astype(jnp.float32) * scale_ref[...] + shift_ref[...]
    out_ref[0] = jnp.where(y >= 0, y, LEAKAGE * y).astype(out_ref.dtype)


# ----------------------------- wrapper ----------------------------------------


@functools.partial(jax.jit, static_argnames=("kernel", "stride", "padding",
                                             "compute_dtype", "interm_dtype"))
def conv_block(x, weight, bias, gamma, beta, *, kernel, stride, padding=1,
               compute_dtype=jnp.float32, interm_dtype=jnp.bfloat16):
    """x: (N,Cin,H,W) NCHW, weight: (Cout,Cin,K,K) — PyTorch conventions.  Returns NCHW."""
    N, Cin, H, W = x.shape
    Cout = weight.shape[0]
    K, S, P = kernel, stride, padding
    assert K >= 1 and S >= 1 and P >= 0
    Hp, Wp = H + 2 * P, W + 2 * P
    assert Hp >= K and Wp >= K, "kernel larger than padded input"

    # Dense (stride-1) extended output grid over the padded image: one conv value per
    # padded position -> every tap is a constant flat offset.  Strided / wrap / padded
    # positions are excluded from stats by a mask and dropped at the end.
    H1, W1 = Hp - K + 1, Wp - K + 1
    H_out = (Hp - K) // S + 1
    W_out = (Wp - K) // S + 1
    Lext = H1 * Wp

    in_item = jnp.dtype(compute_dtype).itemsize
    interm_item = jnp.dtype(interm_dtype).itemsize
    sub = 16 if in_item == 2 else 8
    Cin_p = _round_up(Cin, sub)
    Cp = _round_up(Cout, sub)

    halo = (K - 1) * (Wp + 1)                     # largest tap offset
    halo_pad = max(128, _round_up(halo, 128))

    cap = _vmem_capacity_bytes()
    budget = cap // 2
    vmem_limit = int(cap * 3 // 4)
    THW = _pick_pixel_tile(Lext, Cin_p, Cp, K * K, halo_pad, in_item, interm_item, budget)
    n_tiles = pl.cdiv(Lext, THW)
    Lpad = n_tiles * THW

    # Keep both v7x TensorCores busy at tiny batch: outer "parallel" pixel-group axis.
    if N == 1 and n_tiles > 1 and n_tiles % 2 == 0:
        G = 2
    else:
        G = 1
    T_in = n_tiles // G

    # ---- operand staging (single fused pad/copy; no K*K im2col blowup in HBM) ----
    xp = jnp.pad(x, ((0, 0), (0, Cin_p - Cin), (P, P), (P, P)))
    xflat = xp.reshape(N, Cin_p, Hp * Wp)
    xflat = jnp.pad(xflat, ((0, 0), (0, 0), (0, Lpad + halo_pad - Hp * Wp)))
    xflat = xflat.astype(compute_dtype)

    # Tiny halo array: the halo_pad lanes that follow each pixel tile.
    idx = (jnp.arange(n_tiles)[:, None] + 1) * THW + jnp.arange(halo_pad)[None, :]
    hal = jnp.transpose(xflat[:, :, idx], (0, 2, 1, 3))      # (N, n_tiles, Cin_p, HALO)

    # Validity mask over the extended pixel axis.
    e = jnp.arange(Lpad)
    r, c = e // Wp, e % Wp
    valid = ((e < Lext) & (r % S == 0) & (r // S < H_out)
             & (c % S == 0) & (c // S < W_out) & (c < W1))
    mask = valid.astype(jnp.float32).reshape(1, Lpad)

    w_kk = jnp.transpose(weight, (2, 3, 0, 1)).reshape(K * K, Cout, Cin)
    w_kk = jnp.pad(w_kk, ((0, 0), (0, Cp - Cout), (0, Cin_p - Cin))).astype(compute_dtype)
    b_col = jnp.pad(bias, (0, Cp - Cout)).reshape(Cp, 1).astype(jnp.float32)

    precision = jax.lax.Precision.HIGHEST if in_item == 4 else None
    kern1 = functools.partial(_conv_stats_kernel, kernel=K, wp=Wp, precision=precision)

    cost1 = pl.CostEstimate(
        flops=2 * N * Lpad * K * K * Cin_p * Cp,
        transcendentals=0,
        bytes_accessed=(N * Cin_p * (Lpad + n_tiles * halo_pad) * in_item
                        + N * Cout * Lpad * interm_item
                        + Lpad * 4 + K * K * Cp * Cin_p * in_item))

    convT, psum, psq = pl.pallas_call(
        kern1,
        out_shape=(
            jax.ShapeDtypeStruct((N, Cout, Lpad), interm_dtype),
            jax.ShapeDtypeStruct((N, G, Cp, 1), jnp.float32),
            jax.ShapeDtypeStruct((N, G, Cp, 1), jnp.float32),
        ),
        grid=(N, G, T_in),
        in_specs=[
            pl.BlockSpec((1, Cin_p, THW), lambda n, g, j: (n, 0, g * T_in + j)),
            pl.BlockSpec((1, 1, Cin_p, halo_pad), lambda n, g, j: (n, g * T_in + j, 0, 0)),
            pl.BlockSpec((1, THW), lambda n, g, j: (0, g * T_in + j)),
            pl.BlockSpec((K * K, Cp, Cin_p), lambda n, g, j: (0, 0, 0)),
            pl.BlockSpec((Cp, 1), lambda n, g, j: (0, 0)),
        ],
        out_specs=[
            pl.BlockSpec((1, Cout, THW), lambda n, g, j: (n, 0, g * T_in + j)),
            pl.BlockSpec((1, 1, Cp, 1), lambda n, g, j: (n, g, 0, 0)),
            pl.BlockSpec((1, 1, Cp, 1), lambda n, g, j: (n, g, 0, 0)),
        ],
        scratch_shapes=[pltpu.VMEM((Cin_p, THW + halo_pad), compute_dtype)],
        compiler_params=pltpu.CompilerParams(
            dimension_semantics=("parallel", "parallel", "arbitrary"),
            vmem_limit_bytes=vmem_limit),
        cost_estimate=cost1,
    )(xflat, hal, mask, w_kk, b_col)

    # Finalize BN statistics (tiny, O(Cout), f32) and fold gamma/beta into scale/shift.
    count = float(N * H_out * W_out)
    s1 = jnp.sum(psum[:, :, :Cout, 0], axis=(0, 1))
    s2 = jnp.sum(psq[:, :, :Cout, 0], axis=(0, 1))
    mean_sh = s1 / count                                    # mean of (conv - bias)
    var = jnp.maximum(s2 / count - mean_sh * mean_sh, 0.0)  # Var[conv] (bias-invariant)
    inv_std = jax.lax.rsqrt(var + BN_EPS)
    scale_col = (gamma * inv_std).astype(jnp.float32).reshape(Cout, 1)
    shift_col = (beta - (mean_sh + bias) * gamma * inv_std).astype(jnp.float32).reshape(Cout, 1)

    out_dtype = x.dtype
    alias = {0: 0} if jnp.dtype(interm_dtype) == jnp.dtype(out_dtype) else {}

    cost2 = pl.CostEstimate(
        flops=4 * N * Cout * Lpad,
        transcendentals=0,
        bytes_accessed=N * Cout * Lpad * (interm_item + jnp.dtype(out_dtype).itemsize))

    out_flat = pl.pallas_call(
        _bn_act_kernel,
        out_shape=jax.ShapeDtypeStruct((N, Cout, Lpad), out_dtype),
        grid=(N, n_tiles),
        in_specs=[
            pl.BlockSpec((1, Cout, THW), lambda n, j: (n, 0, j)),
            pl.BlockSpec((Cout, 1), lambda n, j: (0, 0)),
            pl.BlockSpec((Cout, 1), lambda n, j: (0, 0)),
        ],
        out_specs=pl.BlockSpec((1, Cout, THW), lambda n, j: (n, 0, j)),
        input_output_aliases=alias,
        compiler_params=pltpu.CompilerParams(
            dimension_semantics=("parallel", "parallel"),
            vmem_limit_bytes=vmem_limit),
        cost_estimate=cost2,
    )(convT, scale_col, shift_col)

    # Drop wrap/padded columns and apply the stride subsampling (cheap final slice).
    out = out_flat[:, :, :Lext].reshape(N, Cout, H1, Wp)
    out = out[:, :, ::S, ::S][:, :, :H_out, :W_out]
    return out


# ----------------------------- reference & test -------------------------------


def reference(x, weight, bias, gamma, beta, *, kernel, stride, padding=1):
    conv = jax.lax.conv_general_dilated(
        x, weight, window_strides=(stride, stride),
        padding=[(padding, padding), (padding, padding)],
        dimension_numbers=("NCHW", "OIHW", "NCHW"),
    ) + bias.reshape(1, -1, 1, 1)
    mean = jnp.mean(conv, axis=(0, 2, 3), keepdims=True)
    var = jnp.mean((conv - mean) ** 2, axis=(0, 2, 3), keepdims=True)
    y = (conv - mean) * jax.lax.rsqrt(var + BN_EPS)
    y = y * gamma.reshape(1, -1, 1, 1) + beta.reshape(1, -1, 1, 1)
    return jnp.where(y >= 0, y, LEAKAGE * y)


if __name__ == "__main__":
    # Shapes consistent with ConvBlock(in_dim=4, out_dim=8, kernel=3, stride=1)
    N, Cin, H, W = 2, 4, 16, 16
    Cout, K, stride, padding = 8, 3, 1, 1

    key = jax.random.PRNGKey(0)
    kx, kw, kb = jax.random.split(key, 3)

    x = jax.random.normal(kx, (N, Cin, H, W), dtype=jnp.float32)
    fan_in = Cin * K * K
    bound = 1.0 / (fan_in ** 0.5)
    weight = jax.random.uniform(kw, (Cout, Cin, K, K), minval=-bound, maxval=bound,
                                dtype=jnp.float32)
    bias = jax.random.uniform(kb, (Cout,), minval=-bound, maxval=bound, dtype=jnp.float32)
    gamma = jnp.ones((Cout,), dtype=jnp.float32)   # BatchNorm2d default affine init
    beta = jnp.zeros((Cout,), dtype=jnp.float32)

    ref = reference(x, weight, bias, gamma, beta, kernel=K, stride=stride, padding=padding)

    # f32 MXU feed + f32 intermediate (exact-semantics check; pass 2 runs in place).
    out = conv_block(x, weight, bias, gamma, beta, kernel=K, stride=stride, padding=padding,
                     compute_dtype=jnp.float32, interm_dtype=jnp.float32)
    out = jax.block_until_ready(out)
    assert out.shape == ref.shape == (N, Cout, H, W)
    err = float(jnp.max(jnp.abs(out - ref)))
    assert err < 5e-3, f"f32 path max abs err {err}"

    # bf16 MXU feed + bf16 inter-pass activation (fast path); BN stats stay f32, so the
    # small deviation comes only from bf16 rounding of inputs / the stored intermediate.
    out_bf = conv_block(x, weight, bias, gamma, beta, kernel=K, stride=stride, padding=padding,
                        compute_dtype=jnp.bfloat16, interm_dtype=jnp.bfloat16)
    out_bf = jax.block_until_ready(out_bf)
    err_bf = float(jnp.max(jnp.abs(out_bf - ref)))
    assert err_bf < 8e-2, f"bf16 path max abs err {err_bf}"

    print("KERNEL_OK")
</pallas_src>

<mosaic_0001>
module attributes {stable_mosaic.version = 11 : i64} {
  func.func @_bn_act_kernel(%arg0: i32, %arg1: i32, %arg2: memref<1x8x384xf32, #tpu.memory_space<vmem>>, %arg3: memref<8x1xf32, #tpu.memory_space<vmem>>, %arg4: memref<8x1xf32, #tpu.memory_space<vmem>>, %arg5: memref<1x8x384xf32, #tpu.memory_space<vmem>>) attributes {dimension_semantics = [#tpu.dimension_semantics<parallel>, #tpu.dimension_semantics<parallel>], iteration_bounds = array<i64: 2, 1>, scalar_prefetch = 0 : i64, scratch_operands = 0 : i64, tpu.core_type = #tpu.core_type<tc>, window_params = [{transform_indices = @transform_0, window_bounds = array<i64: 1, 8, 384>}, {pipeline_mode = #tpu.pipeline_mode<synchronous>, transform_indices = @transform_1, window_bounds = array<i64: 8, 1>}, {pipeline_mode = #tpu.pipeline_mode<synchronous>, transform_indices = @transform_2, window_bounds = array<i64: 8, 1>}, {transform_indices = @transform_3, window_bounds = array<i64: 1, 8, 384>}]} {
    %c0 = arith.constant 0 : index
    %c0_0 = arith.constant 0 : index
    %c0_1 = arith.constant 0 : index
    %0 = vector.load %arg2[%c0, %c0_0, %c0_1] : memref<1x8x384xf32, #tpu.memory_space<vmem>>, vector<1x8x384xf32>
    %1 = vector.shape_cast %0 : vector<1x8x384xf32> to vector<8x384xf32>
    %c0_2 = arith.constant 0 : index
    %c0_3 = arith.constant 0 : index
    %2 = vector.load %arg3[%c0_2, %c0_3] : memref<8x1xf32, #tpu.memory_space<vmem>>, vector<8x1xf32>
    %3 = vector.broadcast %2 : vector<8x1xf32> to vector<8x384xf32>
    %4 = arith.mulf %1, %3 : vector<8x384xf32>
    %c0_4 = arith.constant 0 : index
    %c0_5 = arith.constant 0 : index
    %5 = vector.load %arg4[%c0_4, %c0_5] : memref<8x1xf32, #tpu.memory_space<vmem>>, vector<8x1xf32>
    %6 = vector.broadcast %5 : vector<8x1xf32> to vector<8x384xf32>
    %7 = arith.addf %4, %6 : vector<8x384xf32>
    %cst = arith.constant 0.000000e+00 : f32
    %8 = vector.broadcast %cst : f32 to vector<8x384xf32>
    %9 = arith.cmpf oge, %7, %8 : vector<8x384xf32>
    %cst_6 = arith.constant 1.000000e-03 : f32
    %10 = vector.broadcast %cst_6 : f32 to vector<8x384xf32>
    %11 = arith.mulf %10, %7 : vector<8x384xf32>
    %12 = arith.select %9, %7, %11 : vector<8x384xi1>, vector<8x384xf32>
    %c0_7 = arith.constant 0 : index
    %c0_8 = arith.constant 0 : index
    %c0_9 = arith.constant 0 : index
    %13 = vector.load %arg5[%c0_7, %c0_8, %c0_9] : memref<1x8x384xf32, #tpu.memory_space<vmem>>, vector<1x8x384xf32>
    %14 = vector.shape_cast %13 : vector<1x8x384xf32> to vector<8x384xf32>
    %15 = vector.shape_cast %12 : vector<8x384xf32> to vector<1x8x384xf32>
    tpu.vector_store %arg5[%c0_7, %c0_8, %c0_9], %15 {strides = array<i32>} : memref<1x8x384xf32, #tpu.memory_space<vmem>>, vector<1x8x384xf32>,
    return
  }
  func.func @transform_0(%arg0: i32, %arg1: i32) -> (i32, i32, i32) {
    %c0_i32 = arith.constant 0 : i32
    %c0_i32_0 = arith.constant 0 : i32
    return %arg0, %c0_i32, %arg1 : i32, i32, i32
  }
  func.func @transform_1(%arg0: i32, %arg1: i32) -> (i32, i32) {
    %c0_i32 = arith.constant 0 : i32
    %c0_i32_0 = arith.constant 0 : i32
    %c0_i32_1 = arith.constant 0 : i32
    return %c0_i32, %c0_i32_0 : i32, i32
  }
  func.func @transform_2(%arg0: i32, %arg1: i32) -> (i32, i32) {
    %c0_i32 = arith.constant 0 : i32
    %c0_i32_0 = arith.constant 0 : i32
    %c0_i32_1 = arith.constant 0 : i32
    return %c0_i32, %c0_i32_0 : i32, i32
  }
  func.func @transform_3(%arg0: i32, %arg1: i32) -> (i32, i32, i32) {
    %c0_i32 = arith.constant 0 : i32
    %c0_i32_0 = arith.constant 0 : i32
    return %arg0, %c0_i32, %arg1 : i32, i32, i32
  }
}

module attributes {stable_mosaic.version = 11 : i64} {
  func.func @_conv_stats_kernel(%arg0: i32, %arg1: i32, %arg2: i32, %arg3: memref<1x8x384xf32, #tpu.memory_space<vmem>>, %arg4: memref<1x1x8x128xf32, #tpu.memory_space<vmem>>, %arg5: memref<1x384xf32, #tpu.memory_space<vmem>>, %arg6: memref<9x8x8xf32, #tpu.memory_space<vmem>>, %arg7: memref<8x1xf32, #tpu.memory_space<vmem>>, %arg8: memref<1x8x384xf32, #tpu.memory_space<vmem>>, %arg9: memref<1x1x8x1xf32, #tpu.memory_space<vmem>>, %arg10: memref<1x1x8x1xf32, #tpu.memory_space<vmem>>, %arg11: memref<8x512xf32, #tpu.memory_space<vmem>>) attributes {dimension_semantics = [#tpu.dimension_semantics<parallel>, #tpu.dimension_semantics<parallel>, #tpu.dimension_semantics<arbitrary>], iteration_bounds = array<i64: 2, 1, 1>, scalar_prefetch = 0 : i64, scratch_operands = 1 : i64, tpu.core_type = #tpu.core_type<tc>, window_params = [{transform_indices = @transform_0, window_bounds = array<i64: 1, 8, 384>}, {transform_indices = @transform_1, window_bounds = array<i64: 1, 1, 8, 128>}, {transform_indices = @transform_2, window_bounds = array<i64: 1, 384>}, {pipeline_mode = #tpu.pipeline_mode<synchronous>, transform_indices = @transform_3, window_bounds = array<i64: 9, 8, 8>}, {pipeline_mode = #tpu.pipeline_mode<synchronous>, transform_indices = @transform_4, window_bounds = array<i64: 8, 1>}, {transform_indices = @transform_5, window_bounds = array<i64: 1, 8, 384>}, {transform_indices = @transform_6, window_bounds = array<i64: 1, 1, 8, 1>}, {transform_indices = @transform_7, window_bounds = array<i64: 1, 1, 8, 1>}]} {
    %c0_i32 = arith.constant 0 : i32
    %0 = arith.cmpi eq, %arg2, %c0_i32 : i32
    %1 = arith.extui %0 : i1 to i32
    %c0_i32_0 = arith.constant 0 : i32
    %2 = arith.cmpi ne, %1, %c0_i32_0 : i32
    scf.if %2 {
      %cst_75 = arith.constant 0.000000e+00 : f32
      %81 = vector.broadcast %cst_75 : f32 to vector<1x1x8x1xf32>
      %c0_76 = arith.constant 0 : index
      %c0_77 = arith.constant 0 : index
      %c0_78 = arith.constant 0 : index
      %c0_79 = arith.constant 0 : index
      %82 = vector.load %arg9[%c0_76, %c0_77, %c0_78, %c0_79] : memref<1x1x8x1xf32, #tpu.memory_space<vmem>>, vector<1x1x8x1xf32>
      tpu.vector_store %arg9[%c0_76, %c0_77, %c0_78, %c0_79], %81 {strides = array<i32>} : memref<1x1x8x1xf32, #tpu.memory_space<vmem>>, vector<1x1x8x1xf32>,
      %cst_80 = arith.constant 0.000000e+00 : f32
      %83 = vector.broadcast %cst_80 : f32 to vector<1x1x8x1xf32>
      %c0_81 = arith.constant 0 : index
      %c0_82 = arith.constant 0 : index
      %c0_83 = arith.constant 0 : index
      %c0_84 = arith.constant 0 : index
      %84 = vector.load %arg10[%c0_81, %c0_82, %c0_83, %c0_84] : memref<1x1x8x1xf32, #tpu.memory_space<vmem>>, vector<1x1x8x1xf32>
      tpu.vector_store %arg10[%c0_81, %c0_82, %c0_83, %c0_84], %83 {strides = array<i32>} : memref<1x1x8x1xf32, #tpu.memory_space<vmem>>, vector<1x1x8x1xf32>,
    } else {
    }
    %c0 = arith.constant 0 : index
    %c0_1 = arith.constant 0 : index
    %c0_2 = arith.constant 0 : index
    %3 = vector.load %arg3[%c0, %c0_1, %c0_2] : memref<1x8x384xf32, #tpu.memory_space<vmem>>, vector<1x8x384xf32>
    %4 = vector.shape_cast %3 : vector<1x8x384xf32> to vector<8x384xf32>
    %c0_3 = arith.constant 0 : index
    %c0_4 = arith.constant 0 : index
    %5 = vector.load %arg11[%c0_3, %c0_4] : memref<8x512xf32, #tpu.memory_space<vmem>>, vector<8x384xf32>
    tpu.vector_store %arg11[%c0_3, %c0_4], %4 {strides = array<i32>} : memref<8x512xf32, #tpu.memory_space<vmem>>, vector<8x384xf32>,
    %c0_5 = arith.constant 0 : index
    %c0_6 = arith.constant 0 : index
    %c0_7 = arith.constant 0 : index
    %c0_8 = arith.constant 0 : index
    %6 = vector.load %arg4[%c0_5, %c0_6, %c0_7, %c0_8] : memref<1x1x8x128xf32, #tpu.memory_space<vmem>>, vector<1x1x8x128xf32>
    %7 = vector.shape_cast %6 : vector<1x1x8x128xf32> to vector<8x128xf32>
    %c0_9 = arith.constant 0 : index
    %c384 = arith.constant 384 : index
    %8 = vector.load %arg11[%c0_9, %c384] : memref<8x512xf32, #tpu.memory_space<vmem>>, vector<8x128xf32>
    tpu.vector_store %arg11[%c0_9, %c384], %7 {strides = array<i32>} : memref<8x512xf32, #tpu.memory_space<vmem>>, vector<8x128xf32>,
    %cst = arith.constant 0.000000e+00 : f32
    %9 = vector.broadcast %cst : f32 to vector<8x384xf32>
    %c0_10 = arith.constant 0 : index
    %c0_11 = arith.constant 0 : index
    %c0_12 = arith.constant 0 : index
    %10 = vector.load %arg6[%c0_10, %c0_11, %c0_12] : memref<9x8x8xf32, #tpu.memory_space<vmem>>, vector<1x8x8xf32>
    %11 = vector.shape_cast %10 : vector<1x8x8xf32> to vector<8x8xf32>
    %c0_13 = arith.constant 0 : index
    %c0_14 = arith.constant 0 : index
    %12 = vector.load %arg11[%c0_13, %c0_14] : memref<8x512xf32, #tpu.memory_space<vmem>>, vector<8x384xf32>
    %cst_15 = arith.constant dense<0.000000e+00> : vector<8x384xf32>
    %13 = tpu.matmul %11, %12, %cst_15 {dimension_numbers = #tpu.dot_dimension_numbers<[1], [0], [0], [1], [0, 0, 1, 1], [], []>, precision = #tpu.contract_precision<fp32>} : vector<8x8xf32>, vector<8x384xf32>, vector<8x384xf32> -> vector<8x384xf32>
    %14 = arith.addf %9, %13 : vector<8x384xf32>
    %c1 = arith.constant 1 : index
    %c0_16 = arith.constant 0 : index
    %c0_17 = arith.constant 0 : index
    %15 = vector.load %arg6[%c1, %c0_16, %c0_17] : memref<9x8x8xf32, #tpu.memory_space<vmem>>, vector<1x8x8xf32>
    %16 = vector.shape_cast %15 : vector<1x8x8xf32> to vector<8x8xf32>
    %c0_18 = arith.constant 0 : index
    %c1_19 = arith.constant 1 : index
    %17 = vector.load %arg11[%c0_18, %c1_19] : memref<8x512xf32, #tpu.memory_space<vmem>>, vector<8x384xf32>
    %cst_20 = arith.constant dense<0.000000e+00> : vector<8x384xf32>
    %18 = tpu.matmul %16, %17, %cst_20 {dimension_numbers = #tpu.dot_dimension_numbers<[1], [0], [0], [1], [0, 0, 1, 1], [], []>, precision = #tpu.contract_precision<fp32>} : vector<8x8xf32>, vector<8x384xf32>, vector<8x384xf32> -> vector<8x384xf32>
    %19 = arith.addf %14, %18 : vector<8x384xf32>
    %c2 = arith.constant 2 : index
    %c0_21 = arith.constant 0 : index
    %c0_22 = arith.constant 0 : index
    %20 = vector.load %arg6[%c2, %c0_21, %c0_22] : memref<9x8x8xf32, #tpu.memory_space<vmem>>, vector<1x8x8xf32>
    %21 = vector.shape_cast %20 : vector<1x8x8xf32> to vector<8x8xf32>
    %c0_23 = arith.constant 0 : index
    %c2_24 = arith.constant 2 : index
    %22 = vector.load %arg11[%c0_23, %c2_24] : memref<8x512xf32, #tpu.memory_space<vmem>>, vector<8x384xf32>
    %cst_25 = arith.constant dense<0.000000e+00> : vector<8x384xf32>
    %23 = tpu.matmul %21, %22, %cst_25 {dimension_numbers = #tpu.dot_dimension_numbers<[1], [0], [0], [1], [0, 0, 1, 1], [], []>, precision = #tpu.contract_precision<fp32>} : vector<8x8xf32>, vector<8x384xf32>, vector<8x384xf32> -> vector<8x384xf32>
    %24 = arith.addf %19, %23 : vector<8x384xf32>
    %c3 = arith.constant 3 : index
    %c0_26 = arith.constant 0 : index
    %c0_27 = arith.constant 0 : index
    %25 = vector.load %arg6[%c3, %c0_26, %c0_27] : memref<9x8x8xf32, #tpu.memory_space<vmem>>, vector<1x8x8xf32>
    %26 = vector.shape_cast %25 : vector<1x8x8xf32> to vector<8x8xf32>
    %c0_28 = arith.constant 0 : index
    %c18 = arith.constant 18 : index
    %27 = vector.load %arg11[%c0_28, %c18] : memref<8x512xf32, #tpu.memory_space<vmem>>, vector<8x384xf32>
    %cst_29 = arith.constant dense<0.000000e+00> : vector<8x384xf32>
    %28 = tpu.matmul %26, %27, %cst_29 {dimension_numbers = #tpu.dot_dimension_numbers<[1], [0], [0], [1], [0, 0, 1, 1], [], []>, precision = #tpu.contract_precision<fp32>} : vector<8x8xf32>, vector<8x384xf32>, vector<8x384xf32> -> vector<8x384xf32>
    %29 = arith.addf %24, %28 : vector<8x384xf32>
    %c4 = arith.constant 4 : index
    %c0_30 = arith.constant 0 : index
    %c0_31 = arith.constant 0 : index
    %30 = vector.load %arg6[%c4, %c0_30, %c0_31] : memref<9x8x8xf32, #tpu.memory_space<vmem>>, vector<1x8x8xf32>
    %31 = vector.shape_cast %30 : vector<1x8x8xf32> to vector<8x8xf32>
    %c0_32 = arith.constant 0 : index
    %c19 = arith.constant 19 : index
    %32 = vector.load %arg11[%c0_32, %c19] : memref<8x512xf32, #tpu.memory_space<vmem>>, vector<8x384xf32>
    %cst_33 = arith.constant dense<0.000000e+00> : vector<8x384xf32>
    %33 = tpu.matmul %31, %32, %cst_33 {dimension_numbers = #tpu.dot_dimension_numbers<[1], [0], [0], [1], [0, 0, 1, 1], [], []>, precision = #tpu.contract_precision<fp32>} : vector<8x8xf32>, vector<8x384xf32>, vector<8x384xf32> -> vector<8x384xf32>
    %34 = arith.addf %29, %33 : vector<8x384xf32>
    %c5 = arith.constant 5 : index
    %c0_34 = arith.constant 0 : index
    %c0_35 = arith.constant 0 : index
    %35 = vector.load %arg6[%c5, %c0_34, %c0_35] : memref<9x8x8xf32, #tpu.memory_space<vmem>>, vector<1x8x8xf32>
    %36 = vector.shape_cast %35 : vector<1x8x8xf32> to vector<8x8xf32>
    %c0_36 = arith.constant 0 : index
    %c20 = arith.constant 20 : index
    %37 = vector.load %arg11[%c0_36, %c20] : memref<8x512xf32, #tpu.memory_space<vmem>>, vector<8x384xf32>
    %cst_37 = arith.constant dense<0.000000e+00> : vector<8x384xf32>
    %38 = tpu.matmul %36, %37, %cst_37 {dimension_numbers = #tpu.dot_dimension_numbers<[1], [0], [0], [1], [0, 0, 1, 1], [], []>, precision = #tpu.contract_precision<fp32>} : vector<8x8xf32>, vector<8x384xf32>, vector<8x384xf32> -> vector<8x384xf32>
    %39 = arith.addf %34, %38 : vector<8x384xf32>
    %c6 = arith.constant 6 : index
    %c0_38 = arith.constant 0 : index
    %c0_39 = arith.constant 0 : index
    %40 = vector.load %arg6[%c6, %c0_38, %c0_39] : memref<9x8x8xf32, #tpu.memory_space<vmem>>, vector<1x8x8xf32>
    %41 = vector.shape_cast %40 : vector<1x8x8xf32> to vector<8x8xf32>
    %c0_40 = arith.constant 0 : index
    %c36 = arith.constant 36 : index
    %42 = vector.load %arg11[%c0_40, %c36] : memref<8x512xf32, #tpu.memory_space<vmem>>, vector<8x384xf32>
    %cst_41 = arith.constant dense<0.000000e+00> : vector<8x384xf32>
    %43 = tpu.matmul %41, %42, %cst_41 {dimension_numbers = #tpu.dot_dimension_numbers<[1], [0], [0], [1], [0, 0, 1, 1], [], []>, precision = #tpu.contract_precision<fp32>} : vector<8x8xf32>, vector<8x384xf32>, vector<8x384xf32> -> vector<8x384xf32>
    %44 = arith.addf %39, %43 : vector<8x384xf32>
    %c7 = arith.constant 7 : index
    %c0_42 = arith.constant 0 : index
    %c0_43 = arith.constant 0 : index
    %45 = vector.load %arg6[%c7, %c0_42, %c0_43] : memref<9x8x8xf32, #tpu.memory_space<vmem>>, vector<1x8x8xf32>
    %46 = vector.shape_cast %45 : vector<1x8x8xf32> to vector<8x8xf32>
    %c0_44 = arith.constant 0 : index
    %c37 = arith.constant 37 : index
    %47 = vector.load %arg11[%c0_44, %c37] : memref<8x512xf32, #tpu.memory_space<vmem>>, vector<8x384xf32>
    %cst_45 = arith.constant dense<0.000000e+00> : vector<8x384xf32>
    %48 = tpu.matmul %46, %47, %cst_45 {dimension_numbers = #tpu.dot_dimension_numbers<[1], [0], [0], [1], [0, 0, 1, 1], [], []>, precision = #tpu.contract_precision<fp32>} : vector<8x8xf32>, vector<8x384xf32>, vector<8x384xf32> -> vector<8x384xf32>
    %49 = arith.addf %44, %48 : vector<8x384xf32>
    %c8 = arith.constant 8 : index
    %c0_46 = arith.constant 0 : index
    %c0_47 = arith.constant 0 : index
    %50 = vector.load %arg6[%c8, %c0_46, %c0_47] : memref<9x8x8xf32, #tpu.memory_space<vmem>>, vector<1x8x8xf32>
    %51 = vector.shape_cast %50 : vector<1x8x8xf32> to vector<8x8xf32>
    %c0_48 = arith.constant 0 : index
    %c38 = arith.constant 38 : index
    %52 = vector.load %arg11[%c0_48, %c38] : memref<8x512xf32, #tpu.memory_space<vmem>>, vector<8x384xf32>
    %cst_49 = arith.constant dense<0.000000e+00> : vector<8x384xf32>
    %53 = tpu.matmul %51, %52, %cst_49 {dimension_numbers = #tpu.dot_dimension_numbers<[1], [0], [0], [1], [0, 0, 1, 1], [], []>, precision = #tpu.contract_precision<fp32>} : vector<8x8xf32>, vector<8x384xf32>, vector<8x384xf32> -> vector<8x384xf32>
    %54 = arith.addf %49, %53 : vector<8x384xf32>
    %c0_50 = arith.constant 0 : index
    %c0_51 = arith.constant 0 : index
    %55 = vector.load %arg7[%c0_50, %c0_51] : memref<8x1xf32, #tpu.memory_space<vmem>>, vector<8x1xf32>
    %56 = vector.broadcast %55 : vector<8x1xf32> to vector<8x384xf32>
    %57 = arith.addf %54, %56 : vector<8x384xf32>
    %c0_52 = arith.constant 0 : index
    %c0_53 = arith.constant 0 : index
    %c0_54 = arith.constant 0 : index
    %58 = vector.load %arg8[%c0_52, %c0_53, %c0_54] : memref<1x8x384xf32, #tpu.memory_space<vmem>>, vector<1x8x384xf32>
    %59 = vector.shape_cast %58 : vector<1x8x384xf32> to vector<8x384xf32>
    %60 = vector.shape_cast %57 : vector<8x384xf32> to vector<1x8x384xf32>
    tpu.vector_store %arg8[%c0_52, %c0_53, %c0_54], %60 {strides = array<i32>} : memref<1x8x384xf32, #tpu.memory_space<vmem>>, vector<1x8x384xf32>,
    %c0_55 = arith.constant 0 : index
    %c0_56 = arith.constant 0 : index
    %61 = vector.load %arg5[%c0_55, %c0_56] : memref<1x384xf32, #tpu.memory_space<vmem>>, vector<1x384xf32>
    %62 = vector.broadcast %61 : vector<1x384xf32> to vector<8x384xf32>
    %63 = arith.mulf %54, %62 : vector<8x384xf32>
    %c0_57 = arith.constant 0 : index
    %c0_58 = arith.constant 0 : index
    %c0_59 = arith.constant 0 : index
    %c0_60 = arith.constant 0 : index
    %64 = vector.load %arg9[%c0_57, %c0_58, %c0_59, %c0_60] : memref<1x1x8x1xf32, #tpu.memory_space<vmem>>, vector<1x1x8x1xf32>
    %65 = vector.shape_cast %64 : vector<1x1x8x1xf32> to vector<8x1xf32>
    %cst_61 = arith.constant dense<0.000000e+00> : vector<8xf32>
    %66 = vector.multi_reduction <add>, %63, %cst_61 [1] : vector<8x384xf32> to vector<8xf32>
    %67 = vector.shape_cast %66 : vector<8xf32> to vector<8x1xf32>
    %68 = arith.addf %65, %67 : vector<8x1xf32>
    %c0_62 = arith.constant 0 : index
    %c0_63 = arith.constant 0 : index
    %c0_64 = arith.constant 0 : index
    %c0_65 = arith.constant 0 : index
    %69 = vector.load %arg9[%c0_62, %c0_63, %c0_64, %c0_65] : memref<1x1x8x1xf32, #tpu.memory_space<vmem>>, vector<1x1x8x1xf32>
    %70 = vector.shape_cast %69 : vector<1x1x8x1xf32> to vector<8x1xf32>
    %71 = vector.shape_cast %68 : vector<8x1xf32> to vector<1x1x8x1xf32>
    tpu.vector_store %arg9[%c0_62, %c0_63, %c0_64, %c0_65], %71 {strides = array<i32>} : memref<1x1x8x1xf32, #tpu.memory_space<vmem>>, vector<1x1x8x1xf32>,
    %c0_66 = arith.constant 0 : index
    %c0_67 = arith.constant 0 : index
    %c0_68 = arith.constant 0 : index
    %c0_69 = arith.constant 0 : index
    %72 = vector.load %arg10[%c0_66, %c0_67, %c0_68, %c0_69] : memref<1x1x8x1xf32, #tpu.memory_space<vmem>>, vector<1x1x8x1xf32>
    %73 = vector.shape_cast %72 : vector<1x1x8x1xf32> to vector<8x1xf32>
    %74 = arith.mulf %63, %54 : vector<8x384xf32>
    %cst_70 = arith.constant dense<0.000000e+00> : vector<8xf32>
    %75 = vector.multi_reduction <add>, %74, %cst_70 [1] : vector<8x384xf32> to vector<8xf32>
    %76 = vector.shape_cast %75 : vector<8xf32> to vector<8x1xf32>
    %77 = arith.addf %73, %76 : vector<8x1xf32>
    %c0_71 = arith.constant 0 : index
    %c0_72 = arith.constant 0 : index
    %c0_73 = arith.constant 0 : index
    %c0_74 = arith.constant 0 : index
    %78 = vector.load %arg10[%c0_71, %c0_72, %c0_73, %c0_74] : memref<1x1x8x1xf32, #tpu.memory_space<vmem>>, vector<1x1x8x1xf32>
    %79 = vector.shape_cast %78 : vector<1x1x8x1xf32> to vector<8x1xf32>
    %80 = vector.shape_cast %77 : vector<8x1xf32> to vector<1x1x8x1xf32>
    tpu.vector_store %arg10[%c0_71, %c0_72, %c0_73, %c0_74], %80 {strides = array<i32>} : memref<1x1x8x1xf32, #tpu.memory_space<vmem>>, vector<1x1x8x1xf32>,
    return
  }
  func.func @transform_0(%arg0: i32, %arg1: i32, %arg2: i32) -> (i32, i32, i32) {
    %c1_i32 = arith.constant 1 : i32
    %0 = arith.muli %arg1, %c1_i32 : i32
    %1 = arith.addi %0, %arg2 : i32
    %c0_i32 = arith.constant 0 : i32
    %c0_i32_0 = arith.constant 0 : i32
    return %arg0, %c0_i32, %1 : i32, i32, i32
  }
  func.func @transform_1(%arg0: i32, %arg1: i32, %arg2: i32) -> (i32, i32, i32, i32) {
    %c1_i32 = arith.constant 1 : i32
    %0 = arith.muli %arg1, %c1_i32 : i32
    %1 = arith.addi %0, %arg2 : i32
    %c0_i32 = arith.constant 0 : i32
    %c0_i32_0 = arith.constant 0 : i32
    %c0_i32_1 = arith.constant 0 : i32
    return %arg0, %1, %c0_i32, %c0_i32_0 : i32, i32, i32, i32
  }
  func.func @transform_2(%arg0: i32, %arg1: i32, %arg2: i32) -> (i32, i32) {
    %c1_i32 = arith.constant 1 : i32
    %0 = arith.muli %arg1, %c1_i32 : i32
    %1 = arith.addi %0, %arg2 : i32
    %c0_i32 = arith.constant 0 : i32
    %c0_i32_0 = arith.constant 0 : i32
    return %c0_i32, %1 : i32, i32
  }
  func.func @transform_3(%arg0: i32, %arg1: i32, %arg2: i32) -> (i32, i32, i32) {
    %c0_i32 = arith.constant 0 : i32
    %c0_i32_0 = arith.constant 0 : i32
    %c0_i32_1 = arith.constant 0 : i32
    %c0_i32_2 = arith.constant 0 : i32
    return %c0_i32, %c0_i32_0, %c0_i32_1 : i32, i32, i32
  }
  func.func @transform_4(%arg0: i32, %arg1: i32, %arg2: i32) -> (i32, i32) {
    %c0_i32 = arith.constant 0 : i32
    %c0_i32_0 = arith.constant 0 : i32
    %c0_i32_1 = arith.constant 0 : i32
    return %c0_i32, %c0_i32_0 : i32, i32
  }
  func.func @transform_5(%arg0: i32, %arg1: i32, %arg2: i32) -> (i32, i32, i32) {
    %c1_i32 = arith.constant 1 : i32
    %0 = arith.muli %arg1, %c1_i32 : i32
    %1 = arith.addi %0, %arg2 : i32
    %c0_i32 = arith.constant 0 : i32
    %c0_i32_0 = arith.constant 0 : i32
    return %arg0, %c0_i32, %1 : i32, i32, i32
  }
  func.func @transform_6(%arg0: i32, %arg1: i32, %arg2: i32) -> (i32, i32, i32, i32) {
    %c0_i32 = arith.constant 0 : i32
    %c0_i32_0 = arith.constant 0 : i32
    %c0_i32_1 = arith.constant 0 : i32
    return %arg0, %arg1, %c0_i32, %c0_i32_0 : i32, i32, i32, i32
  }
  func.func @transform_7(%arg0: i32, %arg1: i32, %arg2: i32) -> (i32, i32, i32, i32) {
    %c0_i32 = arith.constant 0 : i32
    %c0_i32_0 = arith.constant 0 : i32
    %c0_i32_1 = arith.constant 0 : i32
    return %arg0, %arg1, %c0_i32, %c0_i32_0 : i32, i32, i32, i32
  }
}

</mosaic_0001>

<bundles_post_ra>
// kernel: conv_block.3
= control target key start
LH: loop header
LB: loop body
LE: loop exit
PB: predicated region body
PF: predicated region fallthrough
CT: control target
= control target key end

     0   :  { %s411_s12 = smov 0   ;;  %s413_s13 = smov 0   ;;  %s450_s0 = inlined_call_operand.vmem [shape: f32[2,8,384], index: 0, kind: input, shape index: {}, may-alias: {0,3}]   ;;  %s451_s1 = inlined_call_operand.vmem [shape: f32[8,1], index: 1, kind: input, shape index: {}]   ;;  %s452_s2 = inlined_call_operand.vmem [shape: f32[8,1], index: 2, kind: input, shape index: {}]   ;;  %s453_s3 = inlined_call_operand.vmem [shape: f32[2,8,384], index: 3, kind: output, shape index: {}, may-alias: {0,3}]  }
   0x1   :  { %s415_s14 = smov 0  }
   0x2 LB: > { %s25_s15 = sadd.s32 1, %s384_s13  ;;  %p334_p0 = scmp.ge.s32.totalorder %s388_s14, 1  ;;  %s388_s14 = sphi %s415_s14, %s13_s14   ;;  %s384_s13 = sphi %s413_s13, %s455_s13   ;;  %s380_s12 = sphi %s411_s12, %s454_s12  }
   0x3   : > { %p27_p1 = scmp.ge.s32.totalorder %s25_s15, 2  ;;  %p158_p2 = scmp.lt.s32.totalorder %s388_s14, 3 }
   0x5   : > { %s457_s15 = smov (%p27_p1, %s25_s15), 0  ;;  %p159_p3 = pnand %p334_p0, %p158_p2 }
   0x6   : > { %v213_v0 = vld [vmem:[%s451_s1] sm:$0xff] (!%p159_p3)  ;;  %v390_v1 = vmov (!%p159_p3), 0   ;;  %p191_p4 = scmp.lt.s32.totalorder (!%p159_p3), %s380_s12, 1 }
   0x7   : > { %162 = sbr.rel (%p159_p3) target bundleno = 147 (0x93), region = 32  ;;  %365 = vset.pattern.permute.xlu0 (!%p159_p3), %v390_v1  ;;  %v222_v2 = vld [vmem:[%s452_s2] sm:$0xff] (!%p159_p3) }
   0x8   : > { %216 = vperm.xlu0 (!%p159_p3), %365, %v213_v0  }
   0xc   : > { %225 = vperm.xlu0 (!%p159_p3), %365, %v222_v2  }
   0xe   : > { %s459_s12 = smov (!%p191_p4, %s380_s12), 1 }
   0xf   : > { %s339_s20 = smul.u32 24, %s459_s12 }
  0x11   : > { %s198_s23 = scalar_lea.vmem %s450_s0, %s339_s20  ;;  %s208_s26 = scalar_lea.vmem %s453_s3, %s339_s20 }
  0x12   : > { %v210_v4 = vld [vmem:[%s198_s23] sm:$0xff]  ;;  %v211_v5 = vld [vmem:[%s198_s23 + $0x8] sm:$0xff]  ;;  %v212_v6 = vld [vmem:[%s198_s23 + $0x10] sm:$0xff] }
  0x87   : > { %v217_v3 = vpop.permute.xlu0 %216 }
  0x88   : > { %v219_v7 = vmul.f32 %v217_v3, %v210_v4  ;;  %v220_v8 = vmul.f32 %v217_v3, %v211_v5  ;;  %v221_v9 = vmul.f32 %v217_v3, %v212_v6 }
  0x8b   : > { %v226_v10 = vpop.permute.xlu0 %225 }
  0x8c   : > { %v228_v11 = vadd.f32 %v226_v10, %v219_v7  ;;  %v229_v12 = vadd.f32 %v226_v10, %v220_v8  ;;  %v230_v13 = vadd.f32 %v226_v10, %v221_v9 }
  0x8e   : > { %vm231_vm0 = vcmp.ge.f32.partialorder %v228_v11, 0.0  ;;  %vm232_vm1 = vcmp.ge.f32.partialorder %v229_v12, 0.0  ;;  %vm233_vm2 = vcmp.ge.f32.partialorder %v230_v13, 0.0  ;;  %v234_v14 = vmul.f32 0.001, %v228_v11 }
  0x8f   : > { %v235_v15 = vmul.f32 0.001, %v229_v12  ;;  %v236_v16 = vmul.f32 0.001, %v230_v13 }
  0x90   : > { %v237_v17 = vsel %vm231_vm0, %v228_v11, %v234_v14 }
  0x91   : > { %v238_v18 = vsel %vm232_vm1, %v229_v12, %v235_v15  ;;  %v239_v19 = vsel %vm233_vm2, %v230_v13, %v236_v16  ;;  %240 = vst [vmem:[%s208_s26] sm:$0xff] %v237_v17 }
  0x92   : > { %241 = vst [vmem:[%s208_s26 + $0x8] sm:$0xff] %v238_v18  ;;  %242 = vst [vmem:[%s208_s26 + $0x10] sm:$0xff] %v239_v19 }
  0x93 PF: > { %s13_s14 = sadd.s32 1, %s388_s14   ;;  %s454_s12 = smov %s384_s13 }
  0x94   : > { %p10_p5 = scmp.ge.s32.totalorder %s13_s14, 4   ;;  %s455_s13 = smov %s457_s15 }
  0x96   :  { %12 = sbr.rel (!%p10_p5) target bundleno = 2 (0x2), region = 62 }

// kernel: conv_block.2
= control target key start
LH: loop header
LB: loop body
LE: loop exit
PB: predicated region body
PF: predicated region fallthrough
CT: control target
= control target key end

     0   :  { %s9843_s24 = smov 0   ;;  %s9845_s25 = smov 0   ;;  %s10477_s0 = inlined_call_operand.vmem [shape: f32[2,8,512], index: 0, kind: input, shape index: {}]   ;;  %s10478_s1 = inlined_call_operand.vmem [shape: f32[2,1,8,128], index: 1, kind: input, shape index: {}]   ;;  %s10479_s2 = inlined_call_operand.vmem [shape: f32[1,384], index: 2, kind: input, shape index: {}]   ;;  %s10480_s3 = inlined_call_operand.vmem [shape: f32[9,8,8], index: 3, kind: input, shape index: {}]   ;;  %s10481_s4 = inlined_call_operand.vmem [shape: f32[8,1], index: 4, kind: input, shape index: {}]   ;;  %s10482_s5 = inlined_call_operand.vmem [shape: f32[2,8,384], index: 5, kind: output, shape index: {0}]   ;;  %s10483_s6 = inlined_call_operand.vmem [shape: f32[2,1,8,1], index: 6, kind: output, shape index: {1}]   ;;  %s10484_s7 = inlined_call_operand.vmem [shape: f32[2,1,8,1], index: 7, kind: output, shape index: {2}]  }
   0x1   :  { %s9847_s26 = smov 0  }
   0x2 LB: > { %s37_s27 = sadd.s32 1, %s9786_s25  ;;  %p9123_p0 = scmp.ge.s32.totalorder %s9790_s26, 1  ;;  %s9790_s26 = sphi %s9847_s26, %s18_s26   ;;  %s9786_s25 = sphi %s9845_s25, %s10486_s25   ;;  %s9782_s24 = sphi %s9843_s24, %s10485_s24  }
   0x3   : > { %p39_p1 = scmp.ge.s32.totalorder %s37_s27, 2  ;;  %p320_p2 = scmp.lt.s32.totalorder %s9790_s26, 3 }
   0x5   : > { %s10488_s27 = smov (%p39_p1, %s37_s27), 0  ;;  %p321_p3 = pnand %p9123_p0, %p320_p2 }
   0x6   : > { %p399_p4 = scmp.lt.s32.totalorder (!%p321_p3), %s9782_s24, 1  ;;  %v9792_v0 = vmov (!%p321_p3), 0.0   ;;  %vm9793_vm0 = vmmov (!%p321_p3), 0   ;;  %s9794_s13 = smov (!%p321_p3), 127   ;;  %v9130_v5 = vld [vmem:[%s10480_s3 + $0x8] sm:$0xff] (!%p321_p3)  ;;  %vm499_vm1 = vcmask (!%p321_p3), 64512  }
   0x7   : > { %324 = sbr.rel (%p321_p3) target bundleno = 939 (0x3ab), region = 40  ;;  %9249 = vmatprep.subr.mxu1 (!%p321_p3), %v9792_v0  ;;  %9251 = vmatprep.mubr.msk.f32.mxu1 (!%p321_p3), %vm9793_vm0, %v9792_v0  ;;  %s9795_s14 = smov (!%p321_p3), 126   ;;  %v501_v6 = vsel (!%p321_p3), %vm499_vm1, %v9130_v5, 0  ;;  %vm492_vm2 = vcmask (!%p321_p3), 1039360   ;;  %v470_v34 = vld [vmem:[%s10480_s3] sm:$0xff] (!%p321_p3)  ;;  %vm2338_vm3 = vcmask (!%p321_p3), 1031168  }
   0x8   : > { %569 = vmatprep.mubr.f32.mxu0 (!%p321_p3), %v9792_v0  ;;  %s9796_s15 = smov (!%p321_p3), 110   ;;  %s9797_s16 = smov (!%p321_p3), 109   ;;  %v9906_v7 = vand.u32 (!%p321_p3), 4294901760, %v501_v6  ;;  %v1415_v36 = vsel (!%p321_p3), %vm499_vm1, %v470_v34, 0  ;;  %v9131_v59 = vld [vmem:[%s10480_s3 + $0x10] sm:$0xff] (!%p321_p3)  ;;  %vm3272_vm4 = vcmask (!%p321_p3), 900096  }
   0x9   : > { %s9798_s19 = smov (!%p321_p3), 108   ;;  %v9944_v37 = vand.u32 (!%p321_p3), 4294901760, %v1415_v36  ;;  %s9799_s22 = smov (!%p321_p3), 92   ;;  %v2346_v63 = vsel (!%p321_p3), %vm499_vm1, %v9131_v59, 0  ;;  %vm4206_vm5 = vcmask (!%p321_p3), 891904   ;;  %vm5140_vm6 = vcmask (!%p321_p3), 883712  }
   0xa   : > { %v571_v8 = vsub.f32 (!%p321_p3), %v501_v6, %v9906_v7  ;;  %s9800_s30 = smov (!%p321_p3), 91   ;;  %s9801_s10 = smov (!%p321_p3), 90   ;;  %vm6074_vm7 = vcmask (!%p321_p3), 752640   ;;  %vm7008_vm8 = vcmask (!%p321_p3), 744448   ;;  %vm7942_vm9 = vcmask (!%p321_p3), 736256  }
   0xb   : > { %v1485_v41 = vsub.f32 (!%p321_p3), %v1415_v36, %v9944_v37  ;;  %vm459_vm10 = vcmask (!%p321_p3), 7168  }
   0xc   : > { %v572_v9 = vand.u32 (!%p321_p3), 4294901760, %v571_v8 }
   0xd   : > { %v1486_v45 = vand.u32 (!%p321_p3), 4294901760, %v1485_v41 }
   0xe   : > { %s10490_s24 = smov (!%p399_p4, %s9782_s24), 1  ;;  %v573_v13 = vsub.f32 %v571_v8, %v572_v9 }
   0xf   : > { %s9140_s28 = sshll.u32 %s10490_s24, 5  ;;  %s9869_s29 = sshll.u32 %s10490_s24, 3  ;;  %v1487_v49 = vsub.f32 %v1485_v41, %v1486_v45 }
  0x10   : > { %s406_s9 = scalar_lea.vmem %s10477_s0, %s9140_s28  ;;  %s420_s12 = scalar_lea.vmem %s10478_s1, %s9869_s29  ;;  %v574_v20 = vand.u32 4294901760, %v573_v13 }
  0x11   : > { %v9878_v1 = vld [vmem:[%s406_s9 + $0x8] sm:$0xff]  ;;  %v9880_v2 = vld [vmem:[%s406_s9] sm:$0xff]  ;;  %v9884_v3 = vld [vmem:[%s406_s9 + $0x10] sm:$0xff]  ;;  %v1488_v53 = vand.u32 4294901760, %v1487_v49  ;;  %s10443_s23 = scalar_lea.vmem %s10483_s6, %s9869_s29 }
  0x12   : > { %486 = vrot.lane.b32.xlu0 %v9878_v1, %s9794_s13  ;;  %484 = vrot.lane.b32.xlu1 %v9880_v2, %s9794_s13  ;;  %v9886_v4 = vld [vmem:[%s420_s12] sm:$0xff]  ;;  %v9937_v35 = vand.u32 4294901760, %v9878_v1  ;;  %v9952_v39 = vand.u32 4294901760, %v9884_v3  ;;  %v9956_v40 = vand.u32 4294901760, %v9880_v2  ;;  %460 = vst.msk [vmem:[%s10443_s23] sm:$0xff] %vm459_vm10, %v9792_v0 }
  0x14   : > { %v9948_v38 = vsub.f32 %v9878_v1, %v9937_v35  ;;  %v1960_v43 = vsub.f32 %v9884_v3, %v9952_v39  ;;  %v1502_v44 = vsub.f32 %v9880_v2, %v9956_v40 }
  0x16   : > { %488 = vrot.lane.b32.xlu0 %v9884_v3, %s9794_s13  ;;  %490 = vrot.lane.b32.xlu1 %v9886_v4, %s9794_s13  ;;  %v1497_v42 = vand.u32 4294901760, %v9948_v38  ;;  %v1961_v47 = vand.u32 4294901760, %v1960_v43  ;;  %v1503_v48 = vand.u32 4294901760, %v1502_v44  ;;  %s9731_s13 = smul.u32 24, %s10490_s24 }
  0x18   : > { %v1498_v46 = vsub.f32 %v9948_v38, %v1497_v42  ;;  %v1962_v51 = vsub.f32 %v1960_v43, %v1961_v47  ;;  %v1504_v52 = vsub.f32 %v1502_v44, %v1503_v48 }
  0x1a   : > { %2332 = vrot.lane.b32.xlu0 %v9878_v1, %s9795_s14  ;;  %2334 = vrot.lane.b32.xlu1 %v9884_v3, %s9795_s14  ;;  %v1499_v50 = vand.u32 4294901760, %v1498_v46  ;;  %v1963_v54 = vand.u32 4294901760, %v1962_v51  ;;  %v1505_v55 = vand.u32 4294901760, %v1504_v52 }
  0x1e   : > { %2330 = vrot.lane.b32.xlu0 %v9880_v2, %s9795_s14  ;;  %2336 = vrot.lane.b32.xlu1 %v9886_v4, %s9795_s14 }
  0x22   : > { %3266 = vrot.lane.b32.xlu0 %v9878_v1, %s9796_s15  ;;  %3268 = vrot.lane.b32.xlu1 %v9884_v3, %s9796_s15 }
  0x26   : > { %3264 = vrot.lane.b32.xlu0 %v9880_v2, %s9796_s15  ;;  %3270 = vrot.lane.b32.xlu1 %v9886_v4, %s9796_s15  ;;  %s438_s15 = scalar_lea.vmem %s10482_s5, %s9731_s13 }
  0x2a   : > { %4200 = vrot.lane.b32.xlu0 %v9878_v1, %s9797_s16  ;;  %4202 = vrot.lane.b32.xlu1 %v9884_v3, %s9797_s16 }
  0x2e   : > { %4198 = vrot.lane.b32.xlu0 %v9880_v2, %s9797_s16  ;;  %4204 = vrot.lane.b32.xlu1 %v9886_v4, %s9797_s16 }
  0x32   : > { %5134 = vrot.lane.b32.xlu0 %v9878_v1, %s9798_s19  ;;  %5136 = vrot.lane.b32.xlu1 %v9884_v3, %s9798_s19 }
  0x36   : > { %5132 = vrot.lane.b32.xlu0 %v9880_v2, %s9798_s19  ;;  %5138 = vrot.lane.b32.xlu1 %v9886_v4, %s9798_s19 }
  0x3a   : > { %6068 = vrot.lane.b32.xlu0 %v9878_v1, %s9799_s22  ;;  %6070 = vrot.lane.b32.xlu1 %v9884_v3, %s9799_s22 }
  0x3e   : > { %6066 = vrot.lane.b32.xlu0 %v9880_v2, %s9799_s22  ;;  %6072 = vrot.lane.b32.xlu1 %v9886_v4, %s9799_s22 }
  0x42   : > { %7002 = vrot.lane.b32.xlu0 %v9878_v1, %s9800_s30  ;;  %7004 = vrot.lane.b32.xlu1 %v9884_v3, %s9800_s30 }
  0x46   : > { %7000 = vrot.lane.b32.xlu0 %v9880_v2, %s9800_s30  ;;  %7006 = vrot.lane.b32.xlu1 %v9886_v4, %s9800_s30 }
  0x4a   : > { %7936 = vrot.lane.b32.xlu0 %v9878_v1, %s9801_s10  ;;  %7938 = vrot.lane.b32.xlu1 %v9884_v3, %s9801_s10 }
  0x4e   : > { %7934 = vrot.lane.b32.xlu0 %v9880_v2, %s9801_s10  ;;  %7940 = vrot.lane.b32.xlu1 %v9886_v4, %s9801_s10  ;;  %s454_s10 = scalar_lea.vmem %s10484_s7, %s9869_s29 }
  0x4f   : > { %461 = vst.msk [vmem:[%s454_s10] sm:$0xff] %vm459_vm10, %v9792_v0 }
  0x84   : > { %v487_v10 = vpop.permute.xlu0 %486  ;;  %v485_v11 = vpop.permute.xlu1 %484 }
  0x85   : > { %v493_v12 = vsel %vm492_vm2, %v485_v11, %v487_v10 }
  0x86   : > { %v9913_v14 = vand.u32 4294901760, %v493_v12 }
  0x88   : > { %v588_v15 = vsub.f32 %v493_v12, %v9913_v14  ;;  %v489_v16 = vpop.permute.xlu0 %488  ;;  %v491_v17 = vpop.permute.xlu1 %490 }
  0x89   : > { %v494_v18 = vsel %vm492_vm2, %v487_v10, %v489_v16  ;;  %v495_v19 = vsel %vm492_vm2, %v489_v16, %v491_v17 }
  0x8a   : > { %v503_v21 = vand.u32 4294901760, %v494_v18  ;;  %v969_v22 = vand.u32 4294901760, %v495_v19  ;;  %v589_v23 = vand.u32 4294901760, %v588_v15 }
  0x8c   : > { %v582_v24 = vsub.f32 %v494_v18, %v503_v21  ;;  %v1046_v25 = vsub.f32 %v495_v19, %v969_v22  ;;  %504 = vmatprep.subr.mxu0 %v503_v21  ;;  %9250 = vmatpush3.msra.mxu1 %v969_v22  ;;  %v590_v28 = vsub.f32 %v588_v15, %v589_v23  ;;  %v2335_v56 = vpop.permute.xlu1 %2334  ;;  %v2333_v57 = vpop.permute.xlu0 %2332 }
  0x8d   : > { %506 = vmatpush1.msra.mxu0 %v9913_v14  ;;  %9252 = vmatmul.mubr.f32.vlgmr.msra.gmra.mrb[0].mxu1 %v574_v20  ;;  %v2340_v58 = vsel %vm2338_vm3, %v2333_v57, %v2335_v56 }
  0x8e   : > { %v1047_v26 = vand.u32 4294901760, %v1046_v25  ;;  %575 = vmatmul.mubr.f32.vlgmr.msra.gmra.mrb[0].mxu0 %v574_v20  ;;  %9254 = vmatprep.subr.mxu1 %v9792_v0  ;;  %v583_v27 = vand.u32 4294901760, %v582_v24  ;;  %v591_v33 = vand.u32 4294901760, %v590_v28  ;;  %v10005_v60 = vand.u32 4294901760, %v2340_v58 }
  0x8f   : > { %9256 = vmatprep.mubr.msk.f32.mxu1 %vm9793_vm0, %v9792_v0  ;;  %655 = vmatprep.mubr.f32.mxu0 %v9792_v0 }
  0x90   : > { %v1048_v29 = vsub.f32 %v1046_v25, %v1047_v26  ;;  %v584_v30 = vsub.f32 %v582_v24, %v583_v27  ;;  %v2337_v61 = vpop.permute.xlu1 %2336  ;;  %v2331_v62 = vpop.permute.xlu0 %2330  ;;  %v10013_v6 = vsub.f32 %v2340_v58, %v10005_v60 }
  0x91   : > { %v2341_v5 = vsel %vm2338_vm3, %v2335_v56, %v2337_v61 }
  0x92   : > { %v585_v31 = vand.u32 4294901760, %v584_v30  ;;  %v1049_v32 = vand.u32 4294901760, %v1048_v29  ;;  %v2428_v11 = vand.u32 4294901760, %v10013_v6  ;;  %v9132_v29 = vld [vmem:[%s10480_s3 + $0x18] sm:$0xff] }
  0x94   : > { %586 = vmatprep.subr.mxu0 %v585_v31  ;;  %9255 = vmatpush3.msra.mxu1 %v1049_v32 }
  0x95   : > { %592 = vmatpush1.msra.mxu0 %v591_v33  ;;  %9257 = vmatmul.mubr.f32.vlgmr.msra.gmra.mrb[0].mxu1 %v9906_v7  ;;  %v3280_v33 = vsel %vm499_vm1, %v9132_v29, 0 }
  0x96   : > { %9259 = vmatprep.subr.mxu1 %v9792_v0  ;;  %657 = vmatmul.mubr.f32.vlgmr.msra.gmra.mrb[0].mxu0 %v9906_v7 }
  0x97   : > { %665 = vmatprep.subr.mxu0 %v582_v24  ;;  %9260 = vmatpush3.msra.mxu1 %v1046_v25 }
  0x98   : > { %668 = vmatpush1.msra.mxu0 %v588_v15  ;;  %9261 = vmatprep.mubr.msk.f32.mxu1 %vm9793_vm0, %v9792_v0  ;;  %v2429_v15 = vsub.f32 %v10013_v6, %v2428_v11 }
  0x99   : > { %741 = vmatprep.subr.mxu0 %v503_v21  ;;  %9264 = vmatprep.subr.mxu1 %v9792_v0 }
  0x9a   : > { %731 = vmatprep.mubr.f32.mxu0 %v9792_v0  ;;  %v2430_v19 = vand.u32 4294901760, %v2429_v15 }
  0x9d   : > { %9262 = vmatmul.mubr.f32.vlgmr.msra.gmra.mrb[0].mxu1 %v571_v8 }
  0x9e   : > { %9265 = vmatpush3.msra.mxu1 %v969_v22  ;;  %734 = vmatmul.mubr.f32.vlgmr.msra.gmra.mrb[0].mxu0 %v571_v8  ;;  %v10018_v8 = vand.u32 4294901760, %v2346_v63 }
  0x9f   : > { %743 = vmatpush1.msra.mxu0 %v9913_v14  ;;  %9266 = vmatprep.mubr.msk.f32.mxu1 %vm9793_vm0, %v9792_v0 }
  0xa0   : > { %819 = vmatprep.subr.mxu0 %v583_v27  ;;  %9269 = vmatprep.subr.mxu1 %v9792_v0  ;;  %v2416_v12 = vsub.f32 %v2346_v63, %v10018_v8  ;;  %v3267_v27 = vpop.permute.xlu0 %3266 }
  0xa1   : > { %806 = vmatprep.mubr.f32.mxu0 %v9792_v0 }
  0xa2   : > { %v2417_v16 = vand.u32 4294901760, %v2416_v12 }
  0xa4   : > { %v2418_v20 = vsub.f32 %v2416_v12, %v2417_v16  ;;  %v3265_v32 = vpop.permute.xlu0 %3264 }
  0xa5   : > { %9267 = vmatmul.mubr.f32.vlgmr.msra.gmra.mrb[0].mxu1 %v572_v9  ;;  %v3273_v36 = vsel %vm3272_vm4, %v3265_v32, %v3267_v27 }
  0xa6   : > { %9270 = vmatpush3.msra.mxu1 %v1047_v26  ;;  %810 = vmatmul.mubr.f32.vlgmr.msra.gmra.mrb[0].mxu0 %v572_v9  ;;  %v10021_v9 = vand.u32 4294901760, %v2341_v5  ;;  %v3269_v26 = vpop.permute.xlu1 %3268 }
  0xa7   : > { %823 = vmatpush1.msra.mxu0 %v589_v23  ;;  %9271 = vmatprep.mubr.msk.f32.mxu1 %vm9793_vm0, %v9792_v0  ;;  %v2419_v23 = vand.u32 4294901760, %v2418_v20  ;;  %v3274_v28 = vsel %vm3272_vm4, %v3267_v27, %v3269_v26 }
  0xa8   : > { %895 = vmatprep.subr.mxu0 %v503_v21  ;;  %9274 = vmatprep.subr.mxu1 %v9792_v0  ;;  %v2891_v13 = vsub.f32 %v2341_v5, %v10021_v9  ;;  %v10072_v30 = vand.u32 4294901760, %v3274_v28  ;;  %v4201_v52 = vpop.permute.xlu0 %4200 }
  0xa9   : > { %886 = vmatprep.mubr.f32.mxu0 %v9792_v0 }
  0xaa   : > { %v2892_v17 = vand.u32 4294901760, %v2891_v13  ;;  %v3271_v31 = vpop.permute.xlu1 %3270 }
  0xab   : > { %v3275_v34 = vsel %vm3272_vm4, %v3269_v26, %v3271_v31 }
  0xac   : > { %v2893_v21 = vsub.f32 %v2891_v13, %v2892_v17 }
  0xad   : > { %9272 = vmatmul.mubr.f32.vlgmr.msra.gmra.mrb[0].mxu1 %v9906_v7 }
  0xae   : > { %9275 = vmatpush3.msra.mxu1 %v969_v22  ;;  %888 = vmatmul.mubr.f32.vlgmr.msra.gmra.mrb[0].mxu0 %v9906_v7  ;;  %v2894_v24 = vand.u32 4294901760, %v2893_v21  ;;  %v4203_v51 = vpop.permute.xlu1 %4202 }
  0xaf   : > { %897 = vmatpush1.msra.mxu0 %v9913_v14  ;;  %9276 = vmatprep.mubr.msk.f32.mxu1 %vm9793_vm0, %v9792_v0 }
  0xb0   : > { %960 = vmatprep.mubr.f32.mxu0 %v9792_v0  ;;  %9279 = vmatprep.subr.mxu1 %v9792_v0 }
  0xb1   : > { %1418 = vmatprep.subr.mxu0 %v9937_v35 }
  0xb2   : > { %v4205_v56 = vpop.permute.xlu1 %4204 }
  0xb3   : > { %v4209_v59 = vsel %vm4206_vm5, %v4203_v51, %v4205_v56 }
  0xb4   : > { %v10152_v63 = vand.u32 4294901760, %v4209_v59 }
  0xb5   : > { %9277 = vmatmul.mubr.f32.vlgmr.msra.gmra.mrb[0].mxu1 %v9906_v7 }
  0xb6   : > { %962 = vmatmul.mubr.f32.vlgmr.msra.gmra.mrb[0].mxu0 %v9906_v7  ;;  %9280 = vmatpush3.msra.mxu1 %v9952_v39  ;;  %v2339_v7 = vsel %vm2338_vm3, %v2331_v62, %v2333_v57  ;;  %v4199_v57 = vpop.permute.xlu0 %4198  ;;  %v5137_v21 = vpop.permute.xlu1 %5136 }
  0xb7   : > { %9281 = vmatprep.mubr.msk.f32.mxu1 %vm9793_vm0, %v9792_v0  ;;  %1420 = vmatpush1.msra.mxu0 %v9956_v40  ;;  %v10024_v10 = vand.u32 4294901760, %v2339_v7  ;;  %v4207_v61 = vsel %vm4206_vm5, %v4199_v57, %v4201_v52 }
  0xb8   : > { %1483 = vmatprep.mubr.f32.mxu0 %v9792_v0  ;;  %9284 = vmatprep.subr.mxu1 %v9792_v0  ;;  %v10154_v5 = vand.u32 4294901760, %v4207_v61 }
  0xb9   : > { %1500 = vmatprep.subr.mxu0 %v1499_v50  ;;  %v2433_v14 = vsub.f32 %v2339_v7, %v10024_v10 }
  0xba   : > { %v5139_v26 = vpop.permute.xlu1 %5138 }
  0xbb   : > { %v2434_v18 = vand.u32 4294901760, %v2433_v14  ;;  %v5143_v29 = vsel %vm5140_vm6, %v5137_v21, %v5139_v26 }
  0xbd   : > { %9282 = vmatmul.mubr.f32.vlgmr.msra.gmra.mrb[0].mxu1 %v1488_v53  ;;  %v2435_v22 = vsub.f32 %v2433_v14, %v2434_v18 }
  0xbe   : > { %1489 = vmatmul.mubr.f32.vlgmr.msra.gmra.mrb[0].mxu0 %v1488_v53  ;;  %9285 = vmatpush3.msra.mxu1 %v1963_v54  ;;  %v4208_v53 = vsel %vm4206_vm5, %v4201_v52, %v4203_v51  ;;  %v9133_v54 = vld [vmem:[%s10480_s3 + $0x20] sm:$0xff] }
  0xbf   : > { %9286 = vmatprep.mubr.msk.f32.mxu1 %vm9793_vm0, %v9792_v0  ;;  %1506 = vmatpush1.msra.mxu0 %v1505_v55  ;;  %v2436_v25 = vand.u32 4294901760, %v2435_v22  ;;  %v10139_v55 = vand.u32 4294901760, %v4208_v53  ;;  %v4214_v58 = vsel %vm499_vm1, %v9133_v54, 0  ;;  %v5135_v22 = vpop.permute.xlu0 %5134 }
  0xc0   : > { %1569 = vmatprep.mubr.f32.mxu0 %v9792_v0  ;;  %9289 = vmatprep.subr.mxu1 %v9792_v0  ;;  %v10150_v62 = vand.u32 4294901760, %v4214_v58 }
  0xc1   : > { %1579 = vmatprep.subr.mxu0 %v9948_v38  ;;  %v10088_v38 = vand.u32 4294901760, %v3275_v34 }
  0xc2   : > { %v4284_v7 = vsub.f32 %v4214_v58, %v10150_v62 }
  0xc3   : > { %v3825_v1 = vsub.f32 %v3275_v34, %v10088_v38  ;;  %v5133_v27 = vpop.permute.xlu0 %5132 }
  0xc4   : > { %v5141_v31 = vsel %vm5140_vm6, %v5133_v27, %v5135_v22 }
  0xc5   : > { %9287 = vmatmul.mubr.f32.vlgmr.msra.gmra.mrb[0].mxu1 %v9944_v37  ;;  %v10212_v34 = vand.u32 4294901760, %v5141_v31 }
  0xc6   : > { %1571 = vmatmul.mubr.f32.vlgmr.msra.gmra.mrb[0].mxu0 %v9944_v37  ;;  %9290 = vmatpush3.msra.mxu1 %v1960_v43  ;;  %v3826_v43 = vand.u32 4294901760, %v3825_v1 }
  0xc7   : > { %9291 = vmatprep.mubr.msk.f32.mxu1 %vm9793_vm0, %v9792_v0  ;;  %1582 = vmatpush1.msra.mxu0 %v1502_v44 }
  0xc8   : > { %1645 = vmatprep.mubr.f32.mxu0 %v9792_v0  ;;  %9294 = vmatprep.subr.mxu1 %v9792_v0 }
  0xc9   : > { %1655 = vmatprep.subr.mxu0 %v9937_v35 }
  0xcd   : > { %9292 = vmatmul.mubr.f32.vlgmr.msra.gmra.mrb[0].mxu1 %v1485_v41 }
  0xce   : > { %1648 = vmatmul.mubr.f32.vlgmr.msra.gmra.mrb[0].mxu0 %v1485_v41  ;;  %9295 = vmatpush3.msra.mxu1 %v9952_v39 }
  0xcf   : > { %9296 = vmatprep.mubr.msk.f32.mxu1 %vm9793_vm0, %v9792_v0  ;;  %1657 = vmatpush1.msra.mxu0 %v9956_v40 }
  0xd0   : > { %1720 = vmatprep.mubr.f32.mxu0 %v9792_v0  ;;  %9299 = vmatprep.subr.mxu1 %v9792_v0 }
  0xd1   : > { %1733 = vmatprep.subr.mxu0 %v1497_v42 }
  0xd5   : > { %9297 = vmatmul.mubr.f32.vlgmr.msra.gmra.mrb[0].mxu1 %v1486_v45 }
  0xd6   : > { %1724 = vmatmul.mubr.f32.vlgmr.msra.gmra.mrb[0].mxu0 %v1486_v45  ;;  %9300 = vmatpush3.msra.mxu1 %v1961_v47  ;;  %v3827_v47 = vsub.f32 %v3825_v1, %v3826_v43 }
  0xd7   : > { %9301 = vmatprep.mubr.msk.f32.mxu1 %vm9793_vm0, %v9792_v0  ;;  %1737 = vmatpush1.msra.mxu0 %v1503_v48 }
  0xd8   : > { %1800 = vmatprep.mubr.f32.mxu0 %v9792_v0  ;;  %9304 = vmatprep.subr.mxu1 %v9792_v0  ;;  %v3828_v49 = vand.u32 4294901760, %v3827_v47  ;;  %v6071_v47 = vpop.permute.xlu1 %6070 }
  0xd9   : > { %1809 = vmatprep.subr.mxu0 %v9937_v35  ;;  %v10081_v35 = vsub.f32 %v3274_v28, %v10072_v30 }
  0xdc   : > { %v6073_v51 = vpop.permute.xlu1 %6072 }
  0xdd   : > { %9302 = vmatmul.mubr.f32.vlgmr.msra.gmra.mrb[0].mxu1 %v9944_v37  ;;  %v6077_v54 = vsel %vm6074_vm7, %v6071_v47, %v6073_v51 }
  0xde   : > { %1802 = vmatmul.mubr.f32.vlgmr.msra.gmra.mrb[0].mxu0 %v9944_v37  ;;  %9305 = vmatpush3.msra.mxu1 %v9952_v39  ;;  %v10091_v39 = vand.u32 4294901760, %v3273_v36  ;;  %v10268_v58 = vand.u32 4294901760, %v6077_v54 }
  0xdf   : > { %9306 = vmatprep.mubr.msk.f32.mxu1 %vm9793_vm0, %v9792_v0  ;;  %1811 = vmatpush1.msra.mxu0 %v9956_v40  ;;  %v3362_v40 = vand.u32 4294901760, %v10081_v35 }
  0xe0   : > { %1874 = vmatprep.mubr.f32.mxu0 %v9792_v0  ;;  %2349 = vmatprep.subr.mxu0 %v10005_v60  ;;  %v3367_v3 = vsub.f32 %v3273_v36, %v10091_v39 }
  0xe1   : > { %9309 = vmatprep.subr.mxu1 %v9792_v0  ;;  %v3363_v42 = vsub.f32 %v10081_v35, %v3362_v40 }
  0xe2   : > { %v3368_v44 = vand.u32 4294901760, %v3367_v3 }
  0xe3   : > { %v3364_v45 = vand.u32 4294901760, %v3363_v42 }
  0xe4   : > { %v3369_v48 = vsub.f32 %v3367_v3, %v3368_v44 }
  0xe5   : > { %9307 = vmatmul.mubr.f32.vlgmr.msra.gmra.mrb[0].mxu1 %v9944_v37 }
  0xe6   : > { %1876 = vmatmul.mubr.f32.vlgmr.msra.gmra.mrb[0].mxu0 %v9944_v37  ;;  %9310 = vmatpush3.msra.mxu1 %v10021_v9  ;;  %v10085_v37 = vand.u32 4294901760, %v3280_v33  ;;  %v3370_v50 = vand.u32 4294901760, %v3369_v48  ;;  %v6069_v48 = vpop.permute.xlu0 %6068 }
  0xe7   : > { %2351 = vmatpush1.msra.mxu0 %v10024_v10  ;;  %9311 = vmatprep.mubr.msk.f32.mxu1 %vm9793_vm0, %v9792_v0 }
  0xe8   : > { %2414 = vmatprep.mubr.f32.mxu0 %v9792_v0  ;;  %2431 = vmatprep.subr.mxu0 %v2430_v19  ;;  %v3350_v41 = vsub.f32 %v3280_v33, %v10085_v37  ;;  %v10210_v33 = vand.u32 4294901760, %v5143_v29 }
  0xe9   : > { %9314 = vmatprep.subr.mxu1 %v9792_v0 }
  0xea   : > { %v3351_v2 = vand.u32 4294901760, %v3350_v41  ;;  %v6067_v52 = vpop.permute.xlu0 %6066 }
  0xeb   : > { %v6075_v56 = vsel %vm6074_vm7, %v6067_v52, %v6069_v48 }
  0xec   : > { %v3352_v46 = vsub.f32 %v3350_v41, %v3351_v2 }
  0xed   : > { %9312 = vmatmul.mubr.f32.vlgmr.msra.gmra.mrb[0].mxu1 %v2419_v23 }
  0xee   : > { %2420 = vmatmul.mubr.f32.vlgmr.msra.gmra.mrb[0].mxu0 %v2419_v23  ;;  %9315 = vmatpush3.msra.mxu1 %v2894_v24  ;;  %v3353_v4 = vand.u32 4294901760, %v3352_v46  ;;  %v5142_v23 = vsel %vm5140_vm6, %v5135_v22, %v5137_v21  ;;  %v9134_v24 = vld [vmem:[%s10480_s3 + $0x28] sm:$0xff] }
  0xef   : > { %2437 = vmatpush1.msra.mxu0 %v2436_v25  ;;  %9316 = vmatprep.mubr.msk.f32.mxu1 %vm9793_vm0, %v9792_v0  ;;  %v10197_v25 = vand.u32 4294901760, %v5142_v23  ;;  %v5148_v28 = vsel %vm499_vm1, %v9134_v24, 0 }
  0xf0   : > { %2510 = vmatprep.subr.mxu0 %v10013_v6  ;;  %9319 = vmatprep.subr.mxu1 %v9792_v0  ;;  %v10208_v32 = vand.u32 4294901760, %v5148_v28 }
  0xf1   : > { %2500 = vmatprep.mubr.f32.mxu0 %v9792_v0 }
  0xf2   : > { %v5218_v36 = vsub.f32 %v5148_v28, %v10208_v32 }
  0xf5   : > { %9317 = vmatmul.mubr.f32.vlgmr.msra.gmra.mrb[0].mxu1 %v10018_v8 }
  0xf6   : > { %9320 = vmatpush3.msra.mxu1 %v2891_v13  ;;  %2502 = vmatmul.mubr.f32.vlgmr.msra.gmra.mrb[0].mxu0 %v10018_v8 }
  0xf7   : > { %2513 = vmatpush1.msra.mxu0 %v2433_v14  ;;  %9321 = vmatprep.mubr.msk.f32.mxu1 %vm9793_vm0, %v9792_v0 }
  0xf8   : > { %2586 = vmatprep.subr.mxu0 %v10005_v60  ;;  %9324 = vmatprep.subr.mxu1 %v9792_v0 }
  0xf9   : > { %2576 = vmatprep.mubr.f32.mxu0 %v9792_v0 }
  0xfd   : > { %9322 = vmatmul.mubr.f32.vlgmr.msra.gmra.mrb[0].mxu1 %v2416_v12 }
  0xfe   : > { %9325 = vmatpush3.msra.mxu1 %v10021_v9  ;;  %2579 = vmatmul.mubr.f32.vlgmr.msra.gmra.mrb[0].mxu0 %v2416_v12 }
  0xff   : > { %2588 = vmatpush1.msra.mxu0 %v10024_v10  ;;  %9326 = vmatprep.mubr.msk.f32.mxu1 %vm9793_vm0, %v9792_v0 }
 0x100   : > { %2664 = vmatprep.subr.mxu0 %v2428_v11  ;;  %9329 = vmatprep.subr.mxu1 %v9792_v0  ;;  %v4285_v11 = vand.u32 4294901760, %v4284_v7 }
 0x101   : > { %2651 = vmatprep.mubr.f32.mxu0 %v9792_v0 }
 0x102   : > { %v4286_v15 = vsub.f32 %v4284_v7, %v4285_v11 }
 0x105   : > { %9327 = vmatmul.mubr.f32.vlgmr.msra.gmra.mrb[0].mxu1 %v2417_v16 }
 0x106   : > { %9330 = vmatpush3.msra.mxu1 %v2892_v17  ;;  %2655 = vmatmul.mubr.f32.vlgmr.msra.gmra.mrb[0].mxu0 %v2417_v16 }
 0x107   : > { %2668 = vmatpush1.msra.mxu0 %v2434_v18  ;;  %9331 = vmatprep.mubr.msk.f32.mxu1 %vm9793_vm0, %v9792_v0  ;;  %v4287_v18 = vand.u32 4294901760, %v4286_v15 }
 0x108   : > { %2740 = vmatprep.subr.mxu0 %v10005_v60  ;;  %9334 = vmatprep.subr.mxu1 %v9792_v0  ;;  %v4295_v60 = vsub.f32 %v4208_v53, %v10139_v55 }
 0x109   : > { %2731 = vmatprep.mubr.f32.mxu0 %v9792_v0 }
 0x10a   : > { %v4296_v6 = vand.u32 4294901760, %v4295_v60 }
 0x10d   : > { %9332 = vmatmul.mubr.f32.vlgmr.msra.gmra.mrb[0].mxu1 %v10018_v8 }
 0x10e   : > { %9335 = vmatpush3.msra.mxu1 %v10021_v9  ;;  %2733 = vmatmul.mubr.f32.vlgmr.msra.gmra.mrb[0].mxu0 %v10018_v8  ;;  %v4301_v9 = vsub.f32 %v4207_v61, %v10154_v5 }
 0x10f   : > { %2742 = vmatpush1.msra.mxu0 %v10024_v10  ;;  %9336 = vmatprep.mubr.msk.f32.mxu1 %vm9793_vm0, %v9792_v0  ;;  %v4297_v10 = vsub.f32 %v4295_v60, %v4296_v6 }
 0x110   : > { %2805 = vmatprep.mubr.f32.mxu0 %v9792_v0  ;;  %3283 = vmatprep.subr.mxu0 %v10072_v30  ;;  %v4302_v13 = vand.u32 4294901760, %v4301_v9 }
 0x111   : > { %9339 = vmatprep.subr.mxu1 %v9792_v0  ;;  %v4298_v14 = vand.u32 4294901760, %v4297_v10 }
 0x112   : > { %v4303_v17 = vsub.f32 %v4301_v9, %v4302_v13 }
 0x114   : > { %v4304_v20 = vand.u32 4294901760, %v4303_v17  ;;  %v7003_v17 = vpop.permute.xlu0 %7002 }
 0x115   : > { %9337 = vmatmul.mubr.f32.vlgmr.msra.gmra.mrb[0].mxu1 %v10018_v8 }
 0x116   : > { %2807 = vmatmul.mubr.f32.vlgmr.msra.gmra.mrb[0].mxu0 %v10018_v8  ;;  %9340 = vmatpush3.msra.mxu1 %v10088_v38  ;;  %v4759_v8 = vsub.f32 %v4209_v59, %v10152_v63  ;;  %v10270_v59 = vand.u32 4294901760, %v6075_v56 }
 0x117   : > { %3285 = vmatpush1.msra.mxu0 %v10091_v39  ;;  %9341 = vmatprep.mubr.msk.f32.mxu1 %vm9793_vm0, %v9792_v0 }
 0x118   : > { %3348 = vmatprep.mubr.f32.mxu0 %v9792_v0  ;;  %3365 = vmatprep.subr.mxu0 %v3364_v45  ;;  %v4760_v12 = vand.u32 4294901760, %v4759_v8  ;;  %v7001_v22 = vpop.permute.xlu0 %7000 }
 0x119   : > { %9344 = vmatprep.subr.mxu1 %v9792_v0  ;;  %v7009_v26 = vsel %vm7008_vm8, %v7001_v22, %v7003_v17 }
 0x11a   : > { %v4761_v16 = vsub.f32 %v4759_v8, %v4760_v12 }
 0x11c   : > { %v4762_v19 = vand.u32 4294901760, %v4761_v16  ;;  %v7005_v16 = vpop.permute.xlu1 %7004 }
 0x11d   : > { %9342 = vmatmul.mubr.f32.vlgmr.msra.gmra.mrb[0].mxu1 %v3353_v4 }
 0x11e   : > { %3354 = vmatmul.mubr.f32.vlgmr.msra.gmra.mrb[0].mxu0 %v3353_v4  ;;  %9345 = vmatpush3.msra.mxu1 %v3828_v49  ;;  %v6076_v4 = vsel %vm6074_vm7, %v6069_v48, %v6071_v47  ;;  %v9135_v49 = vld [vmem:[%s10480_s3 + $0x30] sm:$0xff] }
 0x11f   : > { %3371 = vmatpush1.msra.mxu0 %v3370_v50  ;;  %9346 = vmatprep.mubr.msk.f32.mxu1 %vm9793_vm0, %v9792_v0  ;;  %v10255_v50 = vand.u32 4294901760, %v6076_v4  ;;  %v6082_v53 = vsel %vm499_vm1, %v9135_v49, 0 }
 0x120   : > { %3444 = vmatprep.subr.mxu0 %v10081_v35  ;;  %9349 = vmatprep.subr.mxu1 %v9792_v0  ;;  %v10266_v57 = vand.u32 4294901760, %v6082_v53  ;;  %v7007_v21 = vpop.permute.xlu1 %7006 }
 0x121   : > { %3434 = vmatprep.mubr.f32.mxu0 %v9792_v0  ;;  %v7011_v24 = vsel %vm7008_vm8, %v7005_v16, %v7007_v21 }
 0x122   : > { %v6152_v61 = vsub.f32 %v6082_v53, %v10266_v57  ;;  %v10326_v28 = vand.u32 4294901760, %v7011_v24 }
 0x125   : > { %9347 = vmatmul.mubr.f32.vlgmr.msra.gmra.mrb[0].mxu1 %v10085_v37 }
 0x126   : > { %9350 = vmatpush3.msra.mxu1 %v3825_v1  ;;  %3436 = vmatmul.mubr.f32.vlgmr.msra.gmra.mrb[0].mxu0 %v10085_v37 }
 0x127   : > { %3447 = vmatpush1.msra.mxu0 %v3367_v3  ;;  %9351 = vmatprep.mubr.msk.f32.mxu1 %vm9793_vm0, %v9792_v0 }
 0x128   : > { %3520 = vmatprep.subr.mxu0 %v10072_v30  ;;  %9354 = vmatprep.subr.mxu1 %v9792_v0 }
 0x129   : > { %3510 = vmatprep.mubr.f32.mxu0 %v9792_v0 }
 0x12d   : > { %9352 = vmatmul.mubr.f32.vlgmr.msra.gmra.mrb[0].mxu1 %v3350_v41 }
 0x12e   : > { %9355 = vmatpush3.msra.mxu1 %v10088_v38  ;;  %3513 = vmatmul.mubr.f32.vlgmr.msra.gmra.mrb[0].mxu0 %v3350_v41 }
 0x12f   : > { %3522 = vmatpush1.msra.mxu0 %v10091_v39  ;;  %9356 = vmatprep.mubr.msk.f32.mxu1 %vm9793_vm0, %v9792_v0 }
 0x130   : > { %3598 = vmatprep.subr.mxu0 %v3362_v40  ;;  %9359 = vmatprep.subr.mxu1 %v9792_v0  ;;  %v5219_v40 = vand.u32 4294901760, %v5218_v36 }
 0x131   : > { %3585 = vmatprep.mubr.f32.mxu0 %v9792_v0 }
 0x132   : > { %v5220_v42 = vsub.f32 %v5218_v36, %v5219_v40 }
 0x135   : > { %9357 = vmatmul.mubr.f32.vlgmr.msra.gmra.mrb[0].mxu1 %v3351_v2 }
 0x136   : > { %9360 = vmatpush3.msra.mxu1 %v3826_v43  ;;  %3589 = vmatmul.mubr.f32.vlgmr.msra.gmra.mrb[0].mxu0 %v3351_v2 }
 0x137   : > { %3602 = vmatpush1.msra.mxu0 %v3368_v44  ;;  %9361 = vmatprep.mubr.msk.f32.mxu1 %vm9793_vm0, %v9792_v0  ;;  %v5221_v44 = vand.u32 4294901760, %v5220_v42 }
 0x138   : > { %3674 = vmatprep.subr.mxu0 %v10072_v30  ;;  %9364 = vmatprep.subr.mxu1 %v9792_v0  ;;  %v5229_v30 = vsub.f32 %v5142_v23, %v10197_v25 }
 0x139   : > { %3665 = vmatprep.mubr.f32.mxu0 %v9792_v0 }
 0x13a   : > { %v5230_v35 = vand.u32 4294901760, %v5229_v30 }
 0x13d   : > { %9362 = vmatmul.mubr.f32.vlgmr.msra.gmra.mrb[0].mxu1 %v10085_v37 }
 0x13e   : > { %9365 = vmatpush3.msra.mxu1 %v10088_v38  ;;  %3667 = vmatmul.mubr.f32.vlgmr.msra.gmra.mrb[0].mxu0 %v10085_v37  ;;  %v5235_v38 = vsub.f32 %v5141_v31, %v10212_v34 }
 0x13f   : > { %3676 = vmatpush1.msra.mxu0 %v10091_v39  ;;  %9366 = vmatprep.mubr.msk.f32.mxu1 %vm9793_vm0, %v9792_v0  ;;  %v5231_v39 = vsub.f32 %v5229_v30, %v5230_v35 }
 0x140   : > { %3739 = vmatprep.mubr.f32.mxu0 %v9792_v0  ;;  %4217 = vmatprep.subr.mxu0 %v10139_v55  ;;  %v5236_v1 = vand.u32 4294901760, %v5235_v38 }
 0x141   : > { %9369 = vmatprep.subr.mxu1 %v9792_v0  ;;  %v5232_v3 = vand.u32 4294901760, %v5231_v39 }
 0x142   : > { %v5237_v43 = vsub.f32 %v5235_v38, %v5236_v1 }
 0x144   : > { %v5238_v46 = vand.u32 4294901760, %v5237_v43  ;;  %v7937_v43 = vpop.permute.xlu0 %7936 }
 0x145   : > { %9367 = vmatmul.mubr.f32.vlgmr.msra.gmra.mrb[0].mxu1 %v10085_v37 }
 0x146   : > { %3741 = vmatmul.mubr.f32.vlgmr.msra.gmra.mrb[0].mxu0 %v10085_v37  ;;  %9370 = vmatpush3.msra.mxu1 %v10152_v63  ;;  %v5693_v37 = vsub.f32 %v5143_v29, %v10210_v33  ;;  %v10328_v29 = vand.u32 4294901760, %v7009_v26 }
 0x147   : > { %4219 = vmatpush1.msra.mxu0 %v10154_v5  ;;  %9371 = vmatprep.mubr.msk.f32.mxu1 %vm9793_vm0, %v9792_v0 }
 0x148   : > { %4282 = vmatprep.mubr.f32.mxu0 %v9792_v0  ;;  %4299 = vmatprep.subr.mxu0 %v4298_v14  ;;  %v5694_v41 = vand.u32 4294901760, %v5693_v37  ;;  %v7935_v48 = vpop.permute.xlu0 %7934 }
 0x149   : > { %9374 = vmatprep.subr.mxu1 %v9792_v0  ;;  %v7943_v51 = vsel %vm7942_vm9, %v7935_v48, %v7937_v43 }
 0x14a   : > { %v5695_v2 = vsub.f32 %v5693_v37, %v5694_v41 }
 0x14c   : > { %v5696_v45 = vand.u32 4294901760, %v5695_v2  ;;  %v7939_v2 = vpop.permute.xlu1 %7938 }
 0x14d   : > { %9372 = vmatmul.mubr.f32.vlgmr.msra.gmra.mrb[0].mxu1 %v4287_v18 }
 0x14e   : > { %4288 = vmatmul.mubr.f32.vlgmr.msra.gmra.mrb[0].mxu0 %v4287_v18  ;;  %9375 = vmatpush3.msra.mxu1 %v4762_v19  ;;  %v7010_v18 = vsel %vm7008_vm8, %v7003_v17, %v7005_v16  ;;  %v9136_v19 = vld [vmem:[%s10480_s3 + $0x38] sm:$0xff] }
 0x14f   : > { %4305 = vmatpush1.msra.mxu0 %v4304_v20  ;;  %9376 = vmatprep.mubr.msk.f32.mxu1 %vm9793_vm0, %v9792_v0  ;;  %v10313_v20 = vand.u32 4294901760, %v7010_v18  ;;  %v7016_v23 = vsel %vm499_vm1, %v9136_v19, 0 }
 0x150   : > { %4378 = vmatprep.subr.mxu0 %v4295_v60  ;;  %9379 = vmatprep.subr.mxu1 %v9792_v0  ;;  %v10324_v27 = vand.u32 4294901760, %v7016_v23  ;;  %v7941_v47 = vpop.permute.xlu1 %7940 }
 0x151   : > { %4368 = vmatprep.mubr.f32.mxu0 %v9792_v0  ;;  %v7945_v49 = vsel %vm7942_vm9, %v7939_v2, %v7941_v47 }
 0x152   : > { %v7086_v31 = vsub.f32 %v7016_v23, %v10324_v27  ;;  %v10384_v53 = vand.u32 4294901760, %v7945_v49 }
 0x155   : > { %9377 = vmatmul.mubr.f32.vlgmr.msra.gmra.mrb[0].mxu1 %v10150_v62 }
 0x156   : > { %9380 = vmatpush3.msra.mxu1 %v4759_v8  ;;  %4370 = vmatmul.mubr.f32.vlgmr.msra.gmra.mrb[0].mxu0 %v10150_v62 }
 0x157   : > { %4381 = vmatpush1.msra.mxu0 %v4301_v9  ;;  %9381 = vmatprep.mubr.msk.f32.mxu1 %vm9793_vm0, %v9792_v0 }
 0x158   : > { %4454 = vmatprep.subr.mxu0 %v10139_v55  ;;  %9384 = vmatprep.subr.mxu1 %v9792_v0 }
 0x159   : > { %4444 = vmatprep.mubr.f32.mxu0 %v9792_v0 }
 0x15d   : > { %9382 = vmatmul.mubr.f32.vlgmr.msra.gmra.mrb[0].mxu1 %v4284_v7 }
 0x15e   : > { %9385 = vmatpush3.msra.mxu1 %v10152_v63  ;;  %4447 = vmatmul.mubr.f32.vlgmr.msra.gmra.mrb[0].mxu0 %v4284_v7 }
 0x15f   : > { %4456 = vmatpush1.msra.mxu0 %v10154_v5  ;;  %9386 = vmatprep.mubr.msk.f32.mxu1 %vm9793_vm0, %v9792_v0 }
 0x160   : > { %4532 = vmatprep.subr.mxu0 %v4296_v6  ;;  %9389 = vmatprep.subr.mxu1 %v9792_v0  ;;  %v6153_v6 = vand.u32 4294901760, %v6152_v61 }
 0x161   : > { %4519 = vmatprep.mubr.f32.mxu0 %v9792_v0 }
 0x162   : > { %v6154_v10 = vsub.f32 %v6152_v61, %v6153_v6 }
 0x165   : > { %9387 = vmatmul.mubr.f32.vlgmr.msra.gmra.mrb[0].mxu1 %v4285_v11 }
 0x166   : > { %9390 = vmatpush3.msra.mxu1 %v4760_v12  ;;  %4523 = vmatmul.mubr.f32.vlgmr.msra.gmra.mrb[0].mxu0 %v4285_v11 }
 0x167   : > { %4536 = vmatpush1.msra.mxu0 %v4302_v13  ;;  %9391 = vmatprep.mubr.msk.f32.mxu1 %vm9793_vm0, %v9792_v0  ;;  %v6155_v13 = vand.u32 4294901760, %v6154_v10 }
 0x168   : > { %4608 = vmatprep.subr.mxu0 %v10139_v55  ;;  %9394 = vmatprep.subr.mxu1 %v9792_v0  ;;  %v6163_v55 = vsub.f32 %v6076_v4, %v10255_v50 }
 0x169   : > { %4599 = vmatprep.mubr.f32.mxu0 %v9792_v0 }
 0x16a   : > { %v6164_v60 = vand.u32 4294901760, %v6163_v55 }
 0x16d   : > { %9392 = vmatmul.mubr.f32.vlgmr.msra.gmra.mrb[0].mxu1 %v10150_v62 }
 0x16e   : > { %9395 = vmatpush3.msra.mxu1 %v10152_v63  ;;  %4601 = vmatmul.mubr.f32.vlgmr.msra.gmra.mrb[0].mxu0 %v10150_v62  ;;  %v6169_v63 = vsub.f32 %v6075_v56, %v10270_v59 }
 0x16f   : > { %4610 = vmatpush1.msra.mxu0 %v10154_v5  ;;  %9396 = vmatprep.mubr.msk.f32.mxu1 %vm9793_vm0, %v9792_v0  ;;  %v6165_v5 = vsub.f32 %v6163_v55, %v6164_v60 }
 0x170   : > { %4673 = vmatprep.mubr.f32.mxu0 %v9792_v0  ;;  %5151 = vmatprep.subr.mxu0 %v10197_v25  ;;  %v6170_v8 = vand.u32 4294901760, %v6169_v63 }
 0x171   : > { %9399 = vmatprep.subr.mxu1 %v9792_v0  ;;  %v6166_v9 = vand.u32 4294901760, %v6165_v5 }
 0x172   : > { %v6171_v12 = vsub.f32 %v6169_v63, %v6170_v8 }
 0x174   : > { %v6172_v15 = vand.u32 4294901760, %v6171_v12  ;;  %v8880_v12 = vlaneseq }
 0x175   : > { %9397 = vmatmul.mubr.f32.vlgmr.msra.gmra.mrb[0].mxu1 %v10150_v62 }
 0x176   : > { %4675 = vmatmul.mubr.f32.vlgmr.msra.gmra.mrb[0].mxu0 %v10150_v62  ;;  %9400 = vmatpush3.msra.mxu1 %v10210_v33  ;;  %v6627_v62 = vsub.f32 %v6077_v54, %v10268_v58  ;;  %v10386_v54 = vand.u32 4294901760, %v7943_v51 }
 0x177   : > { %5153 = vmatpush1.msra.mxu0 %v10212_v34  ;;  %9401 = vmatprep.mubr.msk.f32.mxu1 %vm9793_vm0, %v9792_v0 }
 0x178   : > { %5216 = vmatprep.mubr.f32.mxu0 %v9792_v0  ;;  %5233 = vmatprep.subr.mxu0 %v5232_v3  ;;  %v6628_v7 = vand.u32 4294901760, %v6627_v62 }
 0x179   : > { %9404 = vmatprep.subr.mxu1 %v9792_v0 }
 0x17a   : > { %v6629_v11 = vsub.f32 %v6627_v62, %v6628_v7 }
 0x17c   : > { %v6630_v14 = vand.u32 4294901760, %v6629_v11  ;;  %v9802_v11 = vmov 0  }
 0x17d   : > { %9402 = vmatmul.mubr.f32.vlgmr.msra.gmra.mrb[0].mxu1 %v5221_v44  ;;  %9767 = vset.pattern.permute.xlu0 %v9802_v11 }
 0x17e   : > { %5222 = vmatmul.mubr.f32.vlgmr.msra.gmra.mrb[0].mxu0 %v5221_v44  ;;  %9405 = vmatpush3.msra.mxu1 %v5696_v45  ;;  %v7944_v44 = vsel %vm7942_vm9, %v7937_v43, %v7939_v2  ;;  %v9137_v45 = vld [vmem:[%s10480_s3 + $0x40] sm:$0xff] }
 0x17f   : > { %5239 = vmatpush1.msra.mxu0 %v5238_v46  ;;  %9406 = vmatprep.mubr.msk.f32.mxu1 %vm9793_vm0, %v9792_v0  ;;  %v10371_v46 = vand.u32 4294901760, %v7944_v44  ;;  %v7950_v4 = vsel %vm499_vm1, %v9137_v45, 0 }
 0x180   : > { %5312 = vmatprep.subr.mxu0 %v5229_v30  ;;  %9409 = vmatprep.subr.mxu1 %v9792_v0  ;;  %v10382_v52 = vand.u32 4294901760, %v7950_v4 }
 0x181   : > { %5302 = vmatprep.mubr.f32.mxu0 %v9792_v0 }
 0x182   : > { %v8020_v56 = vsub.f32 %v7950_v4, %v10382_v52 }
 0x185   : > { %9407 = vmatmul.mubr.f32.vlgmr.msra.gmra.mrb[0].mxu1 %v10208_v32 }
 0x186   : > { %9410 = vmatpush3.msra.mxu1 %v5693_v37  ;;  %5304 = vmatmul.mubr.f32.vlgmr.msra.gmra.mrb[0].mxu0 %v10208_v32 }
 0x187   : > { %5315 = vmatpush1.msra.mxu0 %v5235_v38  ;;  %9411 = vmatprep.mubr.msk.f32.mxu1 %vm9793_vm0, %v9792_v0 }
 0x188   : > { %5388 = vmatprep.subr.mxu0 %v10197_v25  ;;  %9414 = vmatprep.subr.mxu1 %v9792_v0 }
 0x189   : > { %5378 = vmatprep.mubr.f32.mxu0 %v9792_v0 }
 0x18d   : > { %9412 = vmatmul.mubr.f32.vlgmr.msra.gmra.mrb[0].mxu1 %v5218_v36 }
 0x18e   : > { %9415 = vmatpush3.msra.mxu1 %v10210_v33  ;;  %5381 = vmatmul.mubr.f32.vlgmr.msra.gmra.mrb[0].mxu0 %v5218_v36 }
 0x18f   : > { %5390 = vmatpush1.msra.mxu0 %v10212_v34  ;;  %9416 = vmatprep.mubr.msk.f32.mxu1 %vm9793_vm0, %v9792_v0 }
 0x190   : > { %5466 = vmatprep.subr.mxu0 %v5230_v35  ;;  %9419 = vmatprep.subr.mxu1 %v9792_v0  ;;  %v7087_v35 = vand.u32 4294901760, %v7086_v31 }
 0x191   : > { %5453 = vmatprep.mubr.f32.mxu0 %v9792_v0 }
 0x192   : > { %v7088_v39 = vsub.f32 %v7086_v31, %v7087_v35 }
 0x195   : > { %9417 = vmatmul.mubr.f32.vlgmr.msra.gmra.mrb[0].mxu1 %v5219_v40 }
 0x196   : > { %9420 = vmatpush3.msra.mxu1 %v5694_v41  ;;  %5457 = vmatmul.mubr.f32.vlgmr.msra.gmra.mrb[0].mxu0 %v5219_v40 }
 0x197   : > { %5470 = vmatpush1.msra.mxu0 %v5236_v1  ;;  %9421 = vmatprep.mubr.msk.f32.mxu1 %vm9793_vm0, %v9792_v0  ;;  %v7089_v1 = vand.u32 4294901760, %v7088_v39 }
 0x198   : > { %5542 = vmatprep.subr.mxu0 %v10197_v25  ;;  %9424 = vmatprep.subr.mxu1 %v9792_v0  ;;  %v7097_v25 = vsub.f32 %v7010_v18, %v10313_v20 }
 0x199   : > { %5533 = vmatprep.mubr.f32.mxu0 %v9792_v0 }
 0x19a   : > { %v7098_v30 = vand.u32 4294901760, %v7097_v25 }
 0x19d   : > { %9422 = vmatmul.mubr.f32.vlgmr.msra.gmra.mrb[0].mxu1 %v10208_v32 }
 0x19e   : > { %9425 = vmatpush3.msra.mxu1 %v10210_v33  ;;  %5535 = vmatmul.mubr.f32.vlgmr.msra.gmra.mrb[0].mxu0 %v10208_v32  ;;  %v7103_v33 = vsub.f32 %v7009_v26, %v10328_v29 }
 0x19f   : > { %5544 = vmatpush1.msra.mxu0 %v10212_v34  ;;  %9426 = vmatprep.mubr.msk.f32.mxu1 %vm9793_vm0, %v9792_v0  ;;  %v7099_v34 = vsub.f32 %v7097_v25, %v7098_v30 }
 0x1a0   : > { %5607 = vmatprep.mubr.f32.mxu0 %v9792_v0  ;;  %6085 = vmatprep.subr.mxu0 %v10255_v50  ;;  %v7104_v37 = vand.u32 4294901760, %v7103_v33 }
 0x1a1   : > { %9429 = vmatprep.subr.mxu1 %v9792_v0  ;;  %v7100_v38 = vand.u32 4294901760, %v7099_v34 }
 0x1a2   : > { %v7105_v41 = vsub.f32 %v7103_v33, %v7104_v37 }
 0x1a4   : > { %v7106_v42 = vand.u32 4294901760, %v7105_v41 }
 0x1a5   : > { %9427 = vmatmul.mubr.f32.vlgmr.msra.gmra.mrb[0].mxu1 %v10208_v32 }
 0x1a6   : > { %5609 = vmatmul.mubr.f32.vlgmr.msra.gmra.mrb[0].mxu0 %v10208_v32  ;;  %9430 = vmatpush3.msra.mxu1 %v10268_v58  ;;  %v7561_v32 = vsub.f32 %v7011_v24, %v10326_v28 }
 0x1a7   : > { %6087 = vmatpush1.msra.mxu0 %v10270_v59  ;;  %9431 = vmatprep.mubr.msk.f32.mxu1 %vm9793_vm0, %v9792_v0 }
 0x1a8   : > { %6150 = vmatprep.mubr.f32.mxu0 %v9792_v0  ;;  %6167 = vmatprep.subr.mxu0 %v6166_v9  ;;  %v7562_v36 = vand.u32 4294901760, %v7561_v32 }
 0x1a9   : > { %9434 = vmatprep.subr.mxu1 %v9792_v0 }
 0x1aa   : > { %v7563_v40 = vsub.f32 %v7561_v32, %v7562_v36 }
 0x1ac   : > { %v7564_v3 = vand.u32 4294901760, %v7563_v40 }
 0x1ad   : > { %9432 = vmatmul.mubr.f32.vlgmr.msra.gmra.mrb[0].mxu1 %v6155_v13 }
 0x1ae   : > { %6156 = vmatmul.mubr.f32.vlgmr.msra.gmra.mrb[0].mxu0 %v6155_v13  ;;  %9435 = vmatpush3.msra.mxu1 %v6630_v14  ;;  %v8881_v13 = vshrl.u32 %v8880_v12, 7 }
 0x1af   : > { %6173 = vmatpush1.msra.mxu0 %v6172_v15  ;;  %9436 = vmatprep.mubr.msk.f32.mxu1 %vm9793_vm0, %v9792_v0  ;;  %v8878_v15 = vld [vmem:[%s10479_s2] sm:$0x7] }
 0x1b0   : > { %6246 = vmatprep.subr.mxu0 %v6163_v55  ;;  %9439 = vmatprep.subr.mxu1 %v9792_v0  ;;  %v8882_v14 = vsub.s32 0, %v8881_v13  ;;  %v8886_v16 = vsub.s32 1, %v8881_v13  ;;  %v8890_v17 = vsub.s32 2, %v8881_v13 }
 0x1b1   : > { %6236 = vmatprep.mubr.f32.mxu0 %v9792_v0 }
 0x1b2   : > { %v8883_v18 = vrot.slane %v8878_v15, %v8882_v14  ;;  %v8887_v19 = vrot.slane %v8878_v15, %v8886_v16 }
 0x1b5   : > { %9437 = vmatmul.mubr.f32.vlgmr.msra.gmra.mrb[0].mxu1 %v10266_v57 }
 0x1b6   : > { %9440 = vmatpush3.msra.mxu1 %v6627_v62  ;;  %6238 = vmatmul.mubr.f32.vlgmr.msra.gmra.mrb[0].mxu0 %v10266_v57 }
 0x1b7   : > { %6249 = vmatpush1.msra.mxu0 %v6169_v63  ;;  %9441 = vmatprep.mubr.msk.f32.mxu1 %vm9793_vm0, %v9792_v0 }
 0x1b8   : > { %6322 = vmatprep.subr.mxu0 %v10255_v50  ;;  %9444 = vmatprep.subr.mxu1 %v9792_v0 }
 0x1b9   : > { %6312 = vmatprep.mubr.f32.mxu0 %v9792_v0 }
 0x1bd   : > { %9442 = vmatmul.mubr.f32.vlgmr.msra.gmra.mrb[0].mxu1 %v6152_v61 }
 0x1be   : > { %9445 = vmatpush3.msra.mxu1 %v10268_v58  ;;  %6315 = vmatmul.mubr.f32.vlgmr.msra.gmra.mrb[0].mxu0 %v6152_v61 }
 0x1bf   : > { %6324 = vmatpush1.msra.mxu0 %v10270_v59  ;;  %9446 = vmatprep.mubr.msk.f32.mxu1 %vm9793_vm0, %v9792_v0 }
 0x1c0   : > { %6400 = vmatprep.subr.mxu0 %v6164_v60  ;;  %9449 = vmatprep.subr.mxu1 %v9792_v0  ;;  %v8021_v60 = vand.u32 4294901760, %v8020_v56 }
 0x1c1   : > { %6387 = vmatprep.mubr.f32.mxu0 %v9792_v0 }
 0x1c2   : > { %v8022_v5 = vsub.f32 %v8020_v56, %v8021_v60 }
 0x1c5   : > { %9447 = vmatmul.mubr.f32.vlgmr.msra.gmra.mrb[0].mxu1 %v6153_v6 }
 0x1c6   : > { %9450 = vmatpush3.msra.mxu1 %v6628_v7  ;;  %6391 = vmatmul.mubr.f32.vlgmr.msra.gmra.mrb[0].mxu0 %v6153_v6 }
 0x1c7   : > { %6404 = vmatpush1.msra.mxu0 %v6170_v8  ;;  %9451 = vmatprep.mubr.msk.f32.mxu1 %vm9793_vm0, %v9792_v0  ;;  %v8023_v8 = vand.u32 4294901760, %v8022_v5 }
 0x1c8   : > { %6476 = vmatprep.subr.mxu0 %v10255_v50  ;;  %9454 = vmatprep.subr.mxu1 %v9792_v0  ;;  %v8031_v50 = vsub.f32 %v7944_v44, %v10371_v46 }
 0x1c9   : > { %6467 = vmatprep.mubr.f32.mxu0 %v9792_v0 }
 0x1ca   : > { %v8032_v55 = vand.u32 4294901760, %v8031_v50 }
 0x1cd   : > { %9452 = vmatmul.mubr.f32.vlgmr.msra.gmra.mrb[0].mxu1 %v10266_v57 }
 0x1ce   : > { %9455 = vmatpush3.msra.mxu1 %v10268_v58  ;;  %6469 = vmatmul.mubr.f32.vlgmr.msra.gmra.mrb[0].mxu0 %v10266_v57  ;;  %v8037_v58 = vsub.f32 %v7943_v51, %v10386_v54 }
 0x1cf   : > { %6478 = vmatpush1.msra.mxu0 %v10270_v59  ;;  %9456 = vmatprep.mubr.msk.f32.mxu1 %vm9793_vm0, %v9792_v0  ;;  %v8033_v59 = vsub.f32 %v8031_v50, %v8032_v55 }
 0x1d0   : > { %6541 = vmatprep.mubr.f32.mxu0 %v9792_v0  ;;  %7019 = vmatprep.subr.mxu0 %v10313_v20  ;;  %v8038_v62 = vand.u32 4294901760, %v8037_v58 }
 0x1d1   : > { %9459 = vmatprep.subr.mxu1 %v9792_v0  ;;  %v8034_v63 = vand.u32 4294901760, %v8033_v59 }
 0x1d2   : > { %v8039_v7 = vsub.f32 %v8037_v58, %v8038_v62 }
 0x1d4   : > { %v8040_v10 = vand.u32 4294901760, %v8039_v7 }
 0x1d5   : > { %9457 = vmatmul.mubr.f32.vlgmr.msra.gmra.mrb[0].mxu1 %v10266_v57 }
 0x1d6   : > { %6543 = vmatmul.mubr.f32.vlgmr.msra.gmra.mrb[0].mxu0 %v10266_v57  ;;  %9460 = vmatpush3.msra.mxu1 %v10326_v28  ;;  %v8495_v57 = vsub.f32 %v7945_v49, %v10384_v53 }
 0x1d7   : > { %7021 = vmatpush1.msra.mxu0 %v10328_v29  ;;  %9461 = vmatprep.mubr.msk.f32.mxu1 %vm9793_vm0, %v9792_v0 }
 0x1d8   : > { %7084 = vmatprep.mubr.f32.mxu0 %v9792_v0  ;;  %7101 = vmatprep.subr.mxu0 %v7100_v38  ;;  %v8496_v61 = vand.u32 4294901760, %v8495_v57  ;;  %v8906_v38 = vld [vmem:[%s454_s10] sm:$0xff] }
 0x1d9   : > { %9464 = vmatprep.subr.mxu1 %v9792_v0 }
 0x1da   : > { %v8497_v6 = vsub.f32 %v8495_v57, %v8496_v61 }
 0x1dc   : > { %v8498_v9 = vand.u32 4294901760, %v8497_v6 }
 0x1dd   : > { %9462 = vmatmul.mubr.f32.vlgmr.msra.gmra.mrb[0].mxu1 %v7089_v1 }
 0x1de   : > { %7090 = vmatmul.mubr.f32.vlgmr.msra.gmra.mrb[0].mxu0 %v7089_v1  ;;  %9465 = vmatpush3.msra.mxu1 %v7564_v3 }
 0x1df   : > { %7107 = vmatpush1.msra.mxu0 %v7106_v42  ;;  %9466 = vmatprep.mubr.msk.f32.mxu1 %vm9793_vm0, %v9792_v0 }
 0x1e0   : > { %7180 = vmatprep.subr.mxu0 %v7097_v25  ;;  %9469 = vmatprep.subr.mxu1 %v9792_v0 }
 0x1e1   : > { %7170 = vmatprep.mubr.f32.mxu0 %v9792_v0 }
 0x1e5   : > { %9467 = vmatmul.mubr.f32.vlgmr.msra.gmra.mrb[0].mxu1 %v10324_v27 }
 0x1e6   : > { %9470 = vmatpush3.msra.mxu1 %v7561_v32  ;;  %7172 = vmatmul.mubr.f32.vlgmr.msra.gmra.mrb[0].mxu0 %v10324_v27 }
 0x1e7   : > { %7183 = vmatpush1.msra.mxu0 %v7103_v33  ;;  %9471 = vmatprep.mubr.msk.f32.mxu1 %vm9793_vm0, %v9792_v0 }
 0x1e8   : > { %7256 = vmatprep.subr.mxu0 %v10313_v20  ;;  %9474 = vmatprep.subr.mxu1 %v9792_v0 }
 0x1e9   : > { %7246 = vmatprep.mubr.f32.mxu0 %v9792_v0 }
 0x1ed   : > { %9472 = vmatmul.mubr.f32.vlgmr.msra.gmra.mrb[0].mxu1 %v7086_v31 }
 0x1ee   : > { %9475 = vmatpush3.msra.mxu1 %v10326_v28  ;;  %7249 = vmatmul.mubr.f32.vlgmr.msra.gmra.mrb[0].mxu0 %v7086_v31 }
 0x1ef   : > { %7258 = vmatpush1.msra.mxu0 %v10328_v29  ;;  %9476 = vmatprep.mubr.msk.f32.mxu1 %vm9793_vm0, %v9792_v0 }
 0x1f0   : > { %7334 = vmatprep.subr.mxu0 %v7098_v30  ;;  %9479 = vmatprep.subr.mxu1 %v9792_v0 }
 0x1f1   : > { %7321 = vmatprep.mubr.f32.mxu0 %v9792_v0 }
 0x1f5   : > { %9477 = vmatmul.mubr.f32.vlgmr.msra.gmra.mrb[0].mxu1 %v7087_v35 }
 0x1f6   : > { %9480 = vmatpush3.msra.mxu1 %v7562_v36  ;;  %7325 = vmatmul.mubr.f32.vlgmr.msra.gmra.mrb[0].mxu0 %v7087_v35  ;;  %v8866_v35 = vld [vmem:[%s10481_s4] sm:$0xff] }
 0x1f7   : > { %7338 = vmatpush1.msra.mxu0 %v7104_v37  ;;  %9481 = vmatprep.mubr.msk.f32.mxu1 %vm9793_vm0, %v9792_v0  ;;  %v8898_v36 = vld [vmem:[%s10443_s23] sm:$0xff] }
 0x1f8   : > { %7410 = vmatprep.subr.mxu0 %v10313_v20  ;;  %9484 = vmatprep.subr.mxu1 %v9792_v0  ;;  %v8891_v20 = vrot.slane %v8878_v15, %v8890_v17 }
 0x1f9   : > { %7401 = vmatprep.mubr.f32.mxu0 %v9792_v0 }
 0x1fd   : > { %9482 = vmatmul.mubr.f32.vlgmr.msra.gmra.mrb[0].mxu1 %v10324_v27 }
 0x1fe   : > { %9485 = vmatpush3.msra.mxu1 %v10326_v28  ;;  %7403 = vmatmul.mubr.f32.vlgmr.msra.gmra.mrb[0].mxu0 %v10324_v27 }
 0x1ff   : > { %7412 = vmatpush1.msra.mxu0 %v10328_v29  ;;  %9486 = vmatprep.mubr.msk.f32.mxu1 %vm9793_vm0, %v9792_v0 }
 0x200   : > { %7475 = vmatprep.mubr.f32.mxu0 %v9792_v0  ;;  %7953 = vmatprep.subr.mxu0 %v10371_v46 }
 0x201   : > { %9489 = vmatprep.subr.mxu1 %v9792_v0 }
 0x205   : > { %9487 = vmatmul.mubr.f32.vlgmr.msra.gmra.mrb[0].mxu1 %v10324_v27 }
 0x206   : > { %7477 = vmatmul.mubr.f32.vlgmr.msra.gmra.mrb[0].mxu0 %v10324_v27  ;;  %9490 = vmatpush3.msra.mxu1 %v10384_v53 }
 0x207   : > { %7955 = vmatpush1.msra.mxu0 %v10386_v54  ;;  %9491 = vmatprep.mubr.msk.f32.mxu1 %vm9793_vm0, %v9792_v0 }
 0x208   : > { %8018 = vmatprep.mubr.f32.mxu0 %v9792_v0  ;;  %8035 = vmatprep.subr.mxu0 %v8034_v63 }
 0x209   : > { %9494 = vmatprep.subr.mxu1 %v9792_v0 }
 0x20d   : > { %9492 = vmatmul.mubr.f32.vlgmr.msra.gmra.mrb[0].mxu1 %v8023_v8 }
 0x20e   : > { %8024 = vmatmul.mubr.f32.vlgmr.msra.gmra.mrb[0].mxu0 %v8023_v8  ;;  %9495 = vmatpush3.msra.mxu1 %v8498_v9 }
 0x20f   : > { %8041 = vmatpush1.msra.mxu0 %v8040_v10  ;;  %9496 = vmatprep.mubr.msk.f32.mxu1 %vm9793_vm0, %v9792_v0 }
 0x210   : > { %8114 = vmatprep.subr.mxu0 %v8031_v50  ;;  %9499 = vmatprep.subr.mxu1 %v9792_v0 }
 0x211   : > { %8104 = vmatprep.mubr.f32.mxu0 %v9792_v0 }
 0x215   : > { %9497 = vmatmul.mubr.f32.vlgmr.msra.gmra.mrb[0].mxu1 %v10382_v52 }
 0x216   : > { %9500 = vmatpush3.msra.mxu1 %v8495_v57  ;;  %8106 = vmatmul.mubr.f32.vlgmr.msra.gmra.mrb[0].mxu0 %v10382_v52 }
 0x217   : > { %8117 = vmatpush1.msra.mxu0 %v8037_v58  ;;  %9501 = vmatprep.mubr.msk.f32.mxu1 %vm9793_vm0, %v9792_v0 }
 0x218   : > { %8190 = vmatprep.subr.mxu0 %v10371_v46  ;;  %9504 = vmatprep.subr.mxu1 %v9792_v0 }
 0x219   : > { %8180 = vmatprep.mubr.f32.mxu0 %v9792_v0 }
 0x21d   : > { %9502 = vmatmul.mubr.f32.vlgmr.msra.gmra.mrb[0].mxu1 %v8020_v56 }
 0x21e   : > { %9505 = vmatpush3.msra.mxu1 %v10384_v53  ;;  %8183 = vmatmul.mubr.f32.vlgmr.msra.gmra.mrb[0].mxu0 %v8020_v56 }
 0x21f   : > { %8192 = vmatpush1.msra.mxu0 %v10386_v54  ;;  %9506 = vmatprep.mubr.msk.f32.mxu1 %vm9793_vm0, %v9792_v0 }
 0x220   : > { %8268 = vmatprep.subr.mxu0 %v8032_v55  ;;  %9509 = vmatprep.subr.mxu1 %v9792_v0 }
 0x221   : > { %8255 = vmatprep.mubr.f32.mxu0 %v9792_v0 }
 0x225   : > { %9507 = vmatmul.mubr.f32.vlgmr.msra.gmra.mrb[0].mxu1 %v8021_v60 }
 0x226   : > { %9510 = vmatpush3.msra.mxu1 %v8496_v61  ;;  %8259 = vmatmul.mubr.f32.vlgmr.msra.gmra.mrb[0].mxu0 %v8021_v60 }
 0x227   : > { %8272 = vmatpush1.msra.mxu0 %v8038_v62  ;;  %9511 = vmatprep.mubr.msk.f32.mxu1 %vm9793_vm0, %v9792_v0 }
 0x228   : > { %8344 = vmatprep.subr.mxu0 %v10371_v46  ;;  %9514 = vmatprep.subr.mxu1 %v9792_v0 }
 0x229   : > { %8335 = vmatprep.mubr.f32.mxu0 %v9792_v0 }
 0x22d   : > { %9512 = vmatmul.mubr.f32.vlgmr.msra.gmra.mrb[0].mxu1 %v10382_v52 }
 0x22e   : > { %9515 = vmatpush3.msra.mxu1 %v10384_v53  ;;  %8337 = vmatmul.mubr.f32.vlgmr.msra.gmra.mrb[0].mxu0 %v10382_v52 }
 0x22f   : > { %8346 = vmatpush1.msra.mxu0 %v10386_v54  ;;  %9516 = vmatprep.mubr.msk.f32.mxu1 %vm9793_vm0, %v9792_v0 }
 0x230   : > { %8409 = vmatprep.mubr.f32.mxu0 %v9792_v0 }
 0x235   : > { %9517 = vmatmul.mubr.f32.vlgmr.msra.gmra.mrb[0].mxu1 %v10382_v52 }
 0x236   : > { %8411 = vmatmul.mubr.f32.vlgmr.msra.gmra.mrb[0].mxu0 %v10382_v52 }
 0x308   : > { %v8859_v21 = vpop.f32.mrb[0].mxu1 }
 0x309   : > { %v8412_v22 = vpop.f32.mrb[0].mxu0  ;;  %v9518_v23 = vpop.f32.mrb[1].mxu1  ;;  %v8897_v27 = vmul.f32 %v8891_v20, %v8859_v21 }
 0x30a   : > { %v8895_v24 = vmul.f32 %v8883_v18, %v8412_v22  ;;  %v8414_v25 = vpop.f32.mrb[1].mxu0 }
 0x30b   : > { %v8896_v26 = vmul.f32 %v8887_v19, %v8414_v25  ;;  %v8909_v32 = vmul.f32 %v8897_v27, %v8859_v21 }
 0x30c   : > { %v8907_v28 = vmul.f32 %v8895_v24, %v8412_v22 }
 0x30d   : > { %v8908_v29 = vmul.f32 %v8896_v26, %v8414_v25  ;;  %v8899_v30 = vadd.f32 %v8896_v26, %v8895_v24 }
 0x30f   : > { %v8900_v31 = vadd.f32 %v8899_v30, %v8897_v27  ;;  %v8910_v33 = vadd.f32 %v8908_v29, %v8907_v28 }
 0x311   : > { %8901 = vadd.xlane.f32.xlu0 %v8900_v31  ;;  %v8911_v34 = vadd.f32 %v8910_v33, %v8909_v32 }
 0x313   : > { %8912 = vadd.xlane.f32.xlu1 %v8911_v34 }
 0x327   : > { %8869 = vperm.xlu0 %9767, %v8866_v35  }
 0x39e   : > { %v8902_v37 = vpop.xlane.xlu0 %8901 }
 0x39f   : > { %v8903_v39 = vadd.f32 %v8902_v37, %v8898_v36 }
 0x3a0   : > { %v8913_v40 = vpop.xlane.xlu1 %8912 }
 0x3a1   : > { %8905 = vst.msk [vmem:[%s10443_s23] sm:$0xff] %vm459_vm10, %v8903_v39  ;;  %v8914_v41 = vadd.f32 %v8913_v40, %v8906_v38 }
 0x3a3   : > { %8915 = vst.msk [vmem:[%s454_s10] sm:$0xff] %vm459_vm10, %v8914_v41 }
 0x3a6   : > { %v8870_v0 = vpop.permute.xlu0 %8869 }
 0x3a7   : > { %v8872_v1 = vadd.f32 %v8870_v0, %v8412_v22  ;;  %v8873_v3 = vadd.f32 %v8870_v0, %v8414_v25  ;;  %v8874_v42 = vadd.f32 %v8870_v0, %v8859_v21 }
 0x3a9   : > { %8875 = vst [vmem:[%s438_s15] sm:$0xff] %v8872_v1  ;;  %8876 = vst [vmem:[%s438_s15 + $0x8] sm:$0xff] %v8873_v3 }
 0x3aa   : > { %8877 = vst [vmem:[%s438_s15 + $0x10] sm:$0xff] %v8874_v42 }
 0x3ab PF: > { %s18_s26 = sadd.s32 1, %s9790_s26   ;;  %s10485_s24 = smov %s9786_s25 }
 0x3ac   : > { %p15_p5 = scmp.ge.s32.totalorder %s18_s26, 4   ;;  %s10486_s25 = smov %s10488_s27 }
 0x3ae   :  { %17 = sbr.rel (!%p15_p5) target bundleno = 2 (0x2), region = 112 }

</bundles_post_ra>
